<compile_context>
chip_gen: v7x
topology: tpu7x:2x2x1
jax: 0.10.0
libtpu: 0.0.40
codegen_flags: <defaults>
</compile_context>

<pallas_src>
import numpy as np
import jax
import jax.numpy as jnp
from jax import lax
from jax.experimental import pallas as pl
from jax.experimental.pallas import tpu as pltpu

# ----- hyperparameters ("args") -----
BS, TS = 2, 4            # batch, time
NE, ED = 8, 16           # n entities, entity feature dim (input_shape)
NA = 4                   # n_agents
E = 32                   # attn_embed_dim
H = 2                    # attn_n_heads
HD = E // H              # head_dim (16)
SW_IN = 16               # sw_input_dim
WSZ = 3                  # sw_window_size
SW_OUT = 32              # sw_output_dim
DEC = 32                 # sw_decoder_hidden_layer
NACT = 8                 # n_actions
KEEP = (WSZ - 1) * SW_IN # carried window width (32)
NEG = -1e30              # "-inf" for masked attention logits

B = BS * TS              # 8 flattened (batch, time) samples
BNE = B * NE             # 64 rows: one per (batch, time, entity)
TSNE = TS * NE           # 32 rows per batch element
NHID = BS * 2 * NE       # 32 hidden-window rows

# ----- packed parameter slab layout (row offsets, all weights 8-row aligned) -----
R_W1, R_WIN, R_WO, R_W2, R_W3, R_W4, R_W5, R_B = 0, 16, 48, 80, 112, 160, 192, 224
SLAB_ROWS, SLAB_COLS = 232, 128

# ----- packed misc-input layout (rows) -----
R_ENT, R_HID, R_GATE = 0, BNE, BNE + NHID        # 0, 64, 96
MISC_ROWS = R_GATE + BNE                         # 160

# ----- packed output layout (lanes): x3 in [0:16], q in [16:24] -----
OUT_COLS = SW_IN + NACT                          # 24


def agent_kernel(misc_ref, mask_ref, slab_ref, out_ref):
    """Single invocation: fc1 -> masked multi-head attention (packed heads,
    deferred-normalized softmax) -> fc2 -> decomposed sliding-window fc3 ->
    fc4 -> fc5 -> agent gate.  Everything is row-batched over BS*TS*NE rows;
    no grid, no per-timestep loop, no VMEM scratch."""
    f32 = jnp.float32

    # ---- parameters: loaded once from the packed slab (static slices) ----
    w1  = slab_ref[R_W1:R_W1 + ED, :E]                     # (16, 32)
    win = slab_ref[R_WIN:R_WIN + E, :3 * E]                # (32, 96)  Q pre-scaled
    wo  = slab_ref[R_WO:R_WO + E, :E]                      # (32, 32)
    w2  = slab_ref[R_W2:R_W2 + E, :SW_IN]                  # (32, 16)
    w3a = slab_ref[R_W3:R_W3 + SW_IN, :SW_OUT]             # (16, 32)  x3[t-2]
    w3b = slab_ref[R_W3 + SW_IN:R_W3 + 2 * SW_IN, :SW_OUT] #           x3[t-1]
    w3c = slab_ref[R_W3 + 2 * SW_IN:R_W3 + 3 * SW_IN, :SW_OUT]  #      x3[t]
    w4  = slab_ref[R_W4:R_W4 + SW_OUT, :DEC]               # (32, 32)
    w5  = slab_ref[R_W5:R_W5 + DEC, :NACT]                 # (32, 8)
    b1  = slab_ref[R_B + 0:R_B + 1, :E]
    bo  = slab_ref[R_B + 1:R_B + 2, :E]
    b2  = slab_ref[R_B + 2:R_B + 3, :SW_IN]
    b3  = slab_ref[R_B + 3:R_B + 4, :SW_OUT]
    b4  = slab_ref[R_B + 4:R_B + 5, :DEC]
    b5  = slab_ref[R_B + 5:R_B + 6, :NACT]

    # ---- packed misc input: entities / hidden-window rows / agent gate ----
    ents = misc_ref[R_ENT:R_ENT + BNE, :]                  # (64, 16)
    hid  = misc_ref[R_HID:R_HID + NHID, :]                 # (32, 16)
    gate = misc_ref[R_GATE:R_GATE + BNE, 0:1]              # (64, 1)  1=active

    # ---- fc1 + relu, qkv projection, batched over all 64 rows ----
    x1 = jnp.maximum(jnp.dot(ents, w1, preferred_element_type=f32) + b1, 0.0)
    qkv = jnp.dot(x1, win, preferred_element_type=f32)     # (64, 96), Q pre-scaled

    q0 = qkv[:, 0:HD]
    q1 = qkv[:, HD:E]
    k0 = qkv[:, E:E + HD]
    k1 = qkv[:, E + HD:2 * E]
    v0 = qkv[:, 2 * E:2 * E + HD]
    v1 = qkv[:, 2 * E + HD:3 * E]

    # ---- both heads' logits packed side-by-side -> full-lane elementwise ----
    dn = (((1,), (1,)), ((), ()))
    l0 = lax.dot_general(q0, k0, dn, preferred_element_type=f32)   # (64, 64)
    l1 = lax.dot_general(q1, k1, dn, preferred_element_type=f32)   # (64, 64)
    lg = jnp.concatenate([l0, l1], axis=1) + mask_ref[...]         # (64, 128)

    m = jnp.max(lg, axis=-1, keepdims=True)
    m = jnp.where(m <= NEG * 0.5, 0.0, m)        # fully-masked rows -> exp()==0
    p = jnp.exp(lg - m)                                            # (64, 128)

    p0 = p[:, :BNE]
    p1 = p[:, BNE:]
    s0 = jnp.sum(p0, axis=-1, keepdims=True)
    s1 = jnp.sum(p1, axis=-1, keepdims=True)
    # deferred softmax normalization via EUP reciprocal (s==0 => p==0 => out 0)
    r0 = pl.reciprocal(jnp.where(s0 > 0.0, s0, 1.0), approx=True)
    r1 = pl.reciprocal(jnp.where(s1 > 0.0, s1, 1.0), approx=True)

    o0 = jnp.dot(p0, v0, preferred_element_type=f32) * r0          # (64, 16)
    o1 = jnp.dot(p1, v1, preferred_element_type=f32) * r1

    # out_trans accumulated per head slice (linearity; avoids concatenate)
    x2 = (jnp.dot(o0, wo[0:HD, :], preferred_element_type=f32)
          + jnp.dot(o1, wo[HD:E, :], preferred_element_type=f32) + bo)
    x2 = x2 * gate                                       # attention post_mask
    x3 = jnp.maximum(jnp.dot(x2, w2, preferred_element_type=f32) + b2, 0.0)  # (64,16)

    # ---- sliding window == shift register, built as values (8-row aligned) ----
    s1p, s2p = [], []
    for b in range(BS):                                  # BS=2, unrolled at trace
        r = b * TSNE
        hb = b * 2 * NE
        h_tm2 = hid[hb:hb + NE, :]                       # hidden slot t-2
        h_tm1 = hid[hb + NE:hb + 2 * NE, :]              # hidden slot t-1
        xb = x3[r:r + TSNE, :]
        s1p.append(jnp.concatenate([h_tm1, xb[:TSNE - NE, :]], axis=0))
        s2p.append(jnp.concatenate([h_tm2, h_tm1, xb[:TSNE - 2 * NE, :]], axis=0))
    shift1 = jnp.concatenate(s1p, axis=0)                # (64, 16)  x3[t-1]
    shift2 = jnp.concatenate(s2p, axis=0)                # (64, 16)  x3[t-2]

    # fc3 on the decomposed window, then fc4 / fc5, all batched over 64 rows
    xo = jnp.maximum(jnp.dot(shift2, w3a, preferred_element_type=f32)
                     + jnp.dot(shift1, w3b, preferred_element_type=f32)
                     + jnp.dot(x3, w3c, preferred_element_type=f32) + b3, 0.0)
    x4 = jnp.maximum(jnp.dot(xo, w4, preferred_element_type=f32) + b4, 0.0)
    qv = (jnp.dot(x4, w5, preferred_element_type=f32) + b5) * gate

    # single packed output slab: x3 in lanes [0:16], q in lanes [16:24]
    out_ref[:, 0:SW_IN] = x3
    out_ref[:, SW_IN:SW_IN + NACT] = qv


def pack_params(p):
    """Pack all weights/biases into one (232,128) f32 slab. Called ONCE at
    init time (hoisted off the per-call path).  The 1/sqrt(head_dim) logit
    scale is folded into the Q columns of the in_trans weight."""
    wint = jnp.asarray(p["wint"], jnp.float32)
    wint = jnp.concatenate([wint[:, :E] * (1.0 / float(np.sqrt(HD))), wint[:, E:]],
                           axis=1)
    slab = jnp.zeros((SLAB_ROWS, SLAB_COLS), jnp.float32)
    slab = slab.at[R_W1:R_W1 + ED, :E].set(p["w1t"])
    slab = slab.at[R_WIN:R_WIN + E, :3 * E].set(wint)
    slab = slab.at[R_WO:R_WO + E, :E].set(p["wot"])
    slab = slab.at[R_W2:R_W2 + E, :SW_IN].set(p["w2t"])
    slab = slab.at[R_W3:R_W3 + WSZ * SW_IN, :SW_OUT].set(p["w3t"])
    slab = slab.at[R_W4:R_W4 + SW_OUT, :DEC].set(p["w4t"])
    slab = slab.at[R_W5:R_W5 + DEC, :NACT].set(p["w5t"])
    slab = slab.at[R_B + 0, :E].set(p["b1"][0])
    slab = slab.at[R_B + 1, :E].set(p["bot"][0])
    slab = slab.at[R_B + 2, :SW_IN].set(p["b2"][0])
    slab = slab.at[R_B + 3, :SW_OUT].set(p["b3"][0])
    slab = slab.at[R_B + 4, :DEC].set(p["b4"][0])
    slab = slab.at[R_B + 5, :NACT].set(p["b5"][0])
    return slab


@jax.jit
def agent_forward(entities, obs_mask, entity_mask, hidden_state, slab):
    """Wrapper: pack the per-call inputs into 2 arrays (+ the prebuilt param
    slab), run the fused kernel once, unpack q and the new window."""
    ents = entities.reshape(BNE, ED).astype(jnp.float32)

    # additive attention mask (0 visible / NEG masked), block-diagonal over the
    # B flattened samples, duplicated along lanes for both heads -> (64, 128)
    obs3 = obs_mask.reshape(B, NE, NE)
    block = jnp.where(obs3 > 0.5, NEG, 0.0).astype(jnp.float32)      # (8,8,8)
    same = jnp.eye(B, dtype=bool)
    mask_add = jnp.where(same[:, None, :, None], block[:, :, None, :], NEG)
    mask_add = mask_add.reshape(BNE, BNE).astype(jnp.float32)
    mask2 = jnp.concatenate([mask_add, mask_add], axis=1)            # (64,128)

    # agent post-mask as a multiplicative gate (1 = active, 0 = masked)
    gate = jnp.where(entity_mask.reshape(BNE, 1) > 0.5, 0.0, 1.0).astype(jnp.float32)

    # hidden window -> rows aligned with (batch, slot s in {t-2, t-1}, entity)
    h = hidden_state.reshape(BS, NA, 2, SW_IN)
    h = jnp.transpose(h, (0, 2, 1, 3))                       # [b, slot, agent, f]
    h = jnp.pad(h, ((0, 0), (0, 0), (0, NE - NA), (0, 0)))   # pad agents -> entities
    hid_rows = h.reshape(NHID, SW_IN).astype(jnp.float32)

    # one packed (160,16) misc input: ents rows 0:64, hid rows 64:96, gate 96:160
    misc = jnp.concatenate(
        [ents, hid_rows, jnp.broadcast_to(gate, (BNE, SW_IN))], axis=0)

    vmem = pl.BlockSpec(memory_space=pltpu.MemorySpace.VMEM)
    out = pl.pallas_call(
        agent_kernel,
        out_shape=jax.ShapeDtypeStruct((BNE, OUT_COLS), jnp.float32),
        in_specs=[vmem, vmem, vmem],
        out_specs=vmem,
    )(misc, mask2, slab)

    # layout plumbing (wrapper side): keep only agent rows, rebuild the window
    x3 = out[:, :SW_IN].reshape(BS, TS, NE, SW_IN)
    q = out[:, SW_IN:SW_IN + NACT].reshape(BS, TS, NE, NACT)[:, :, :NA, :]
    window = (x3[:, TS - 2:, :NA, :]          # last two timesteps (TS >= WSZ-1)
              .transpose(0, 2, 1, 3)
              .reshape(BS, NA, KEEP))
    return q, window


def reference_forward(entities, obs_mask, entity_mask, hidden_state, p):
    """Pure-JAX mirror of the PyTorch forward (eval mode)."""
    bs, ts, ne, ed = entities.shape
    Bf = bs * ts
    ents = entities.reshape(Bf, ne, ed)
    obs = obs_mask.reshape(Bf, ne, ne)
    entm = entity_mask.reshape(Bf, ne)
    am = entm[:, :NA]

    x1 = jax.nn.relu(jnp.einsum('bne,eo->bno', ents, p['w1t']) + p['b1'])
    qkv = jnp.einsum('bne,eo->bno', x1, p['wint'])
    qh = qkv[:, :NA, :E].reshape(Bf, NA, H, HD)
    kh = qkv[:, :, E:2 * E].reshape(Bf, ne, H, HD)
    vh = qkv[:, :, 2 * E:].reshape(Bf, ne, H, HD)
    logits = jnp.einsum('bahd,bkhd->bhak', qh, kh) / np.sqrt(HD)
    mask = (obs[:, :NA, :] > 0.5)[:, None]
    logits = jnp.where(mask, NEG, logits)
    mx = logits.max(-1, keepdims=True)
    mx = jnp.where(mx <= NEG * 0.5, 0.0, mx)
    pe = jnp.exp(logits - mx)
    s = pe.sum(-1, keepdims=True)
    w = jnp.where(s > 0, pe / jnp.where(s > 0, s, 1.0), 0.0)
    out = jnp.einsum('bhak,bkhd->bahd', w, vh).reshape(Bf, NA, E)
    x2 = out @ p['wot'] + p['bot']
    x2 = jnp.where(am[..., None] > 0.5, 0.0, x2)
    x3 = jax.nn.relu(x2 @ p['w2t'] + p['b2']).reshape(bs, ts, NA, SW_IN)

    window = hidden_state.reshape(bs, NA, KEEP)
    xs = []
    for t in range(ts):
        curr = jnp.concatenate([window, x3[:, t]], axis=2)
        xs.append(jax.nn.relu(curr @ p['w3t'] + p['b3']))
        window = curr[:, :, -KEEP:]
    xs = jnp.stack(xs, axis=1)
    x4 = jax.nn.relu(xs @ p['w4t'] + p['b4'])
    q = x4 @ p['w5t'] + p['b5']
    q = jnp.where(am.reshape(bs, ts, NA, 1) > 0.5, 0.0, q)
    return q, window


if __name__ == "__main__":
    key = jax.random.PRNGKey(0)
    ks = jax.random.split(key, 20)

    def init(k, shape, scale=0.1):
        return scale * jax.random.normal(k, shape, dtype=jnp.float32)

    params = {
        "w1t": init(ks[0], (ED, E)),               "b1": init(ks[1], (1, E)),
        "wint": init(ks[2], (E, 3 * E)),           # attention in_trans (no bias)
        "wot": init(ks[3], (E, E)),                "bot": init(ks[4], (1, E)),
        "w2t": init(ks[5], (E, SW_IN)),            "b2": init(ks[6], (1, SW_IN)),
        "w3t": init(ks[7], (WSZ * SW_IN, SW_OUT)), "b3": init(ks[8], (1, SW_OUT)),
        "w4t": init(ks[9], (SW_OUT, DEC)),         "b4": init(ks[10], (1, DEC)),
        "w5t": init(ks[11], (DEC, NACT)),          "b5": init(ks[12], (1, NACT)),
    }

    entities = jax.random.normal(ks[13], (BS, TS, NE, ED), dtype=jnp.float32)
    obs_mask = (jax.random.uniform(ks[14], (BS, TS, NE, NE)) < 0.3).astype(jnp.float32)
    entity_mask = (jax.random.uniform(ks[15], (BS, TS, NE)) < 0.2).astype(jnp.float32)
    hidden_state = 0.1 * jax.random.normal(ks[16], (BS, NA, KEEP), dtype=jnp.float32)

    # parameter slab is built ONCE at init time (hoisted off the call path)
    slab = jax.block_until_ready(pack_params(params))

    q, window = agent_forward(entities, obs_mask, entity_mask, hidden_state, slab)
    jax.block_until_ready((q, window))

    q_ref, w_ref = reference_forward(entities, obs_mask, entity_mask, hidden_state, params)
    assert q.shape == (BS, TS, NA, NACT) and window.shape == (BS, NA, KEEP)
    assert np.allclose(np.asarray(q), np.asarray(q_ref), atol=3e-3, rtol=3e-3)
    assert np.allclose(np.asarray(window), np.asarray(w_ref), atol=3e-3, rtol=3e-3)

    # TODO(synk): dropout layers, repeat_attn>0 and attn-weight bookkeeping
    # (ret_attn_logits / ret_attn_weights, stateful self.attn_weights concat)
    # are inference-disabled config paths and are not reproduced in-kernel.
    # TODO(synk): optional bf16 weight/activation slab for v6e/v7x (kept f32
    # here for v5e and for exact parity with the f32 reference tolerance).
    print("KERNEL_OK")
</pallas_src>

<mosaic_0001>
module attributes {stable_mosaic.version = 11 : i64} {
  func.func @agent_kernel(%arg0: memref<160x16xf32, #tpu.memory_space<vmem>>, %arg1: memref<64x128xf32, #tpu.memory_space<vmem>>, %arg2: memref<232x128xf32, #tpu.memory_space<vmem>>, %arg3: memref<64x24xf32, #tpu.memory_space<vmem>>) attributes {dimension_semantics = [], scalar_prefetch = 0 : i64, scratch_operands = 0 : i64, tpu.core_type = #tpu.core_type<tc>} {
    %c0 = arith.constant 0 : index
    %c0_0 = arith.constant 0 : index
    %0 = vector.load %arg2[%c0, %c0_0] : memref<232x128xf32, #tpu.memory_space<vmem>>, vector<16x32xf32>
    %c16 = arith.constant 16 : index
    %c0_1 = arith.constant 0 : index
    %1 = vector.load %arg2[%c16, %c0_1] : memref<232x128xf32, #tpu.memory_space<vmem>>, vector<32x96xf32>
    %c48 = arith.constant 48 : index
    %c0_2 = arith.constant 0 : index
    %2 = vector.load %arg2[%c48, %c0_2] : memref<232x128xf32, #tpu.memory_space<vmem>>, vector<32x32xf32>
    %c80 = arith.constant 80 : index
    %c0_3 = arith.constant 0 : index
    %3 = vector.load %arg2[%c80, %c0_3] : memref<232x128xf32, #tpu.memory_space<vmem>>, vector<32x16xf32>
    %c112 = arith.constant 112 : index
    %c0_4 = arith.constant 0 : index
    %4 = vector.load %arg2[%c112, %c0_4] : memref<232x128xf32, #tpu.memory_space<vmem>>, vector<16x32xf32>
    %c128 = arith.constant 128 : index
    %c0_5 = arith.constant 0 : index
    %5 = vector.load %arg2[%c128, %c0_5] : memref<232x128xf32, #tpu.memory_space<vmem>>, vector<16x32xf32>
    %c144 = arith.constant 144 : index
    %c0_6 = arith.constant 0 : index
    %6 = vector.load %arg2[%c144, %c0_6] : memref<232x128xf32, #tpu.memory_space<vmem>>, vector<16x32xf32>
    %c160 = arith.constant 160 : index
    %c0_7 = arith.constant 0 : index
    %7 = vector.load %arg2[%c160, %c0_7] : memref<232x128xf32, #tpu.memory_space<vmem>>, vector<32x32xf32>
    %c192 = arith.constant 192 : index
    %c0_8 = arith.constant 0 : index
    %8 = vector.load %arg2[%c192, %c0_8] : memref<232x128xf32, #tpu.memory_space<vmem>>, vector<32x8xf32>
    %c224 = arith.constant 224 : index
    %c0_9 = arith.constant 0 : index
    %9 = vector.load %arg2[%c224, %c0_9] : memref<232x128xf32, #tpu.memory_space<vmem>>, vector<1x32xf32>
    %c225 = arith.constant 225 : index
    %c0_10 = arith.constant 0 : index
    %10 = vector.load %arg2[%c225, %c0_10] : memref<232x128xf32, #tpu.memory_space<vmem>>, vector<1x32xf32>
    %c226 = arith.constant 226 : index
    %c0_11 = arith.constant 0 : index
    %11 = vector.load %arg2[%c226, %c0_11] : memref<232x128xf32, #tpu.memory_space<vmem>>, vector<1x16xf32>
    %c227 = arith.constant 227 : index
    %c0_12 = arith.constant 0 : index
    %12 = vector.load %arg2[%c227, %c0_12] : memref<232x128xf32, #tpu.memory_space<vmem>>, vector<1x32xf32>
    %c228 = arith.constant 228 : index
    %c0_13 = arith.constant 0 : index
    %13 = vector.load %arg2[%c228, %c0_13] : memref<232x128xf32, #tpu.memory_space<vmem>>, vector<1x32xf32>
    %c229 = arith.constant 229 : index
    %c0_14 = arith.constant 0 : index
    %14 = vector.load %arg2[%c229, %c0_14] : memref<232x128xf32, #tpu.memory_space<vmem>>, vector<1x8xf32>
    %c0_15 = arith.constant 0 : index
    %c0_16 = arith.constant 0 : index
    %15 = vector.load %arg0[%c0_15, %c0_16] : memref<160x16xf32, #tpu.memory_space<vmem>>, vector<64x16xf32>
    %c64 = arith.constant 64 : index
    %c0_17 = arith.constant 0 : index
    %16 = vector.load %arg0[%c64, %c0_17] : memref<160x16xf32, #tpu.memory_space<vmem>>, vector<32x16xf32>
    %c96 = arith.constant 96 : index
    %c0_18 = arith.constant 0 : index
    %17 = vector.load %arg0[%c96, %c0_18] : memref<160x16xf32, #tpu.memory_space<vmem>>, vector<64x1xf32>
    %cst = arith.constant dense<0.000000e+00> : vector<64x32xf32>
    %18 = tpu.matmul %15, %0, %cst {dimension_numbers = #tpu.dot_dimension_numbers<[1], [0], [0], [1], [0, 0, 1, 1], [], []>} : vector<64x16xf32>, vector<16x32xf32>, vector<64x32xf32> -> vector<64x32xf32>
    %19 = vector.broadcast %9 : vector<1x32xf32> to vector<64x32xf32>
    %20 = arith.addf %18, %19 : vector<64x32xf32>
    %cst_19 = arith.constant 0.000000e+00 : f32
    %21 = vector.broadcast %cst_19 : f32 to vector<64x32xf32>
    %22 = arith.maximumf %20, %21 : vector<64x32xf32>
    %cst_20 = arith.constant dense<0.000000e+00> : vector<64x96xf32>
    %23 = tpu.matmul %22, %1, %cst_20 {dimension_numbers = #tpu.dot_dimension_numbers<[1], [0], [0], [1], [0, 0, 1, 1], [], []>} : vector<64x32xf32>, vector<32x96xf32>, vector<64x96xf32> -> vector<64x96xf32>
    %24 = vector.extract_strided_slice %23 {offsets = [0, 0], sizes = [64, 16], strides = [1, 1]} : vector<64x96xf32> to vector<64x16xf32>
    %25 = vector.extract_strided_slice %23 {offsets = [0, 16], sizes = [64, 16], strides = [1, 1]} : vector<64x96xf32> to vector<64x16xf32>
    %26 = vector.extract_strided_slice %23 {offsets = [0, 32], sizes = [64, 16], strides = [1, 1]} : vector<64x96xf32> to vector<64x16xf32>
    %27 = vector.extract_strided_slice %23 {offsets = [0, 48], sizes = [64, 16], strides = [1, 1]} : vector<64x96xf32> to vector<64x16xf32>
    %28 = vector.extract_strided_slice %23 {offsets = [0, 64], sizes = [64, 16], strides = [1, 1]} : vector<64x96xf32> to vector<64x16xf32>
    %29 = vector.extract_strided_slice %23 {offsets = [0, 80], sizes = [64, 16], strides = [1, 1]} : vector<64x96xf32> to vector<64x16xf32>
    %cst_21 = arith.constant dense<0.000000e+00> : vector<64x64xf32>
    %30 = tpu.matmul %24, %26, %cst_21 {dimension_numbers = #tpu.dot_dimension_numbers<[1], [1], [0], [0], [0, 0, 1, 0], [], []>} : vector<64x16xf32>, vector<64x16xf32>, vector<64x64xf32> -> vector<64x64xf32>
    %cst_22 = arith.constant dense<0.000000e+00> : vector<64x64xf32>
    %31 = tpu.matmul %25, %27, %cst_22 {dimension_numbers = #tpu.dot_dimension_numbers<[1], [1], [0], [0], [0, 0, 1, 0], [], []>} : vector<64x16xf32>, vector<64x16xf32>, vector<64x64xf32> -> vector<64x64xf32>
    %32 = tpu.concatenate %30, %31 in 1 : vector<64x64xf32>, vector<64x64xf32> -> vector<64x128xf32>
    %c0_23 = arith.constant 0 : index
    %c0_24 = arith.constant 0 : index
    %33 = vector.load %arg1[%c0_23, %c0_24] : memref<64x128xf32, #tpu.memory_space<vmem>>, vector<64x128xf32>
    %34 = arith.addf %32, %33 : vector<64x128xf32>
    %cst_25 = arith.constant dense<0xFF800000> : vector<64xf32>
    %35 = vector.multi_reduction <maximumf>, %34, %cst_25 [1] : vector<64x128xf32> to vector<64xf32>
    %36 = vector.shape_cast %35 : vector<64xf32> to vector<64x1xf32>
    %cst_26 = arith.constant -5.000000e+29 : f32
    %37 = vector.broadcast %cst_26 : f32 to vector<64x1xf32>
    %38 = arith.cmpf ole, %36, %37 : vector<64x1xf32>
    %cst_27 = arith.constant 0.000000e+00 : f32
    %39 = vector.broadcast %cst_27 : f32 to vector<64x1xf32>
    %40 = arith.select %38, %39, %36 : vector<64x1xi1>, vector<64x1xf32>
    %41 = vector.broadcast %40 : vector<64x1xf32> to vector<64x128xf32>
    %42 = arith.subf %34, %41 : vector<64x128xf32>
    %43 = math.exp %42 : vector<64x128xf32>
    %44 = vector.extract_strided_slice %43 {offsets = [0, 0], sizes = [64, 64], strides = [1, 1]} : vector<64x128xf32> to vector<64x64xf32>
    %45 = vector.extract_strided_slice %43 {offsets = [0, 64], sizes = [64, 64], strides = [1, 1]} : vector<64x128xf32> to vector<64x64xf32>
    %cst_28 = arith.constant dense<0.000000e+00> : vector<64xf32>
    %46 = vector.multi_reduction <add>, %44, %cst_28 [1] : vector<64x64xf32> to vector<64xf32>
    %47 = vector.shape_cast %46 : vector<64xf32> to vector<64x1xf32>
    %cst_29 = arith.constant dense<0.000000e+00> : vector<64xf32>
    %48 = vector.multi_reduction <add>, %45, %cst_29 [1] : vector<64x64xf32> to vector<64xf32>
    %49 = vector.shape_cast %48 : vector<64xf32> to vector<64x1xf32>
    %cst_30 = arith.constant 0.000000e+00 : f32
    %50 = vector.broadcast %cst_30 : f32 to vector<64x1xf32>
    %51 = arith.cmpf ogt, %47, %50 : vector<64x1xf32>
    %cst_31 = arith.constant 1.000000e+00 : f32
    %52 = vector.broadcast %cst_31 : f32 to vector<64x1xf32>
    %53 = arith.select %51, %47, %52 : vector<64x1xi1>, vector<64x1xf32>
    %54 = tpu.reciprocal %53 {approx = true} : vector<64x1xf32> -> vector<64x1xf32>
    %cst_32 = arith.constant 0.000000e+00 : f32
    %55 = vector.broadcast %cst_32 : f32 to vector<64x1xf32>
    %56 = arith.cmpf ogt, %49, %55 : vector<64x1xf32>
    %cst_33 = arith.constant 1.000000e+00 : f32
    %57 = vector.broadcast %cst_33 : f32 to vector<64x1xf32>
    %58 = arith.select %56, %49, %57 : vector<64x1xi1>, vector<64x1xf32>
    %59 = tpu.reciprocal %58 {approx = true} : vector<64x1xf32> -> vector<64x1xf32>
    %cst_34 = arith.constant dense<0.000000e+00> : vector<64x16xf32>
    %60 = tpu.matmul %44, %28, %cst_34 {dimension_numbers = #tpu.dot_dimension_numbers<[1], [0], [0], [1], [0, 0, 1, 1], [], []>} : vector<64x64xf32>, vector<64x16xf32>, vector<64x16xf32> -> vector<64x16xf32>
    %61 = vector.broadcast %54 : vector<64x1xf32> to vector<64x16xf32>
    %62 = arith.mulf %60, %61 : vector<64x16xf32>
    %cst_35 = arith.constant dense<0.000000e+00> : vector<64x16xf32>
    %63 = tpu.matmul %45, %29, %cst_35 {dimension_numbers = #tpu.dot_dimension_numbers<[1], [0], [0], [1], [0, 0, 1, 1], [], []>} : vector<64x64xf32>, vector<64x16xf32>, vector<64x16xf32> -> vector<64x16xf32>
    %64 = vector.broadcast %59 : vector<64x1xf32> to vector<64x16xf32>
    %65 = arith.mulf %63, %64 : vector<64x16xf32>
    %66 = vector.extract_strided_slice %2 {offsets = [0, 0], sizes = [16, 32], strides = [1, 1]} : vector<32x32xf32> to vector<16x32xf32>
    %cst_36 = arith.constant dense<0.000000e+00> : vector<64x32xf32>
    %67 = tpu.matmul %62, %66, %cst_36 {dimension_numbers = #tpu.dot_dimension_numbers<[1], [0], [0], [1], [0, 0, 1, 1], [], []>} : vector<64x16xf32>, vector<16x32xf32>, vector<64x32xf32> -> vector<64x32xf32>
    %68 = vector.extract_strided_slice %2 {offsets = [16, 0], sizes = [16, 32], strides = [1, 1]} : vector<32x32xf32> to vector<16x32xf32>
    %cst_37 = arith.constant dense<0.000000e+00> : vector<64x32xf32>
    %69 = tpu.matmul %65, %68, %cst_37 {dimension_numbers = #tpu.dot_dimension_numbers<[1], [0], [0], [1], [0, 0, 1, 1], [], []>} : vector<64x16xf32>, vector<16x32xf32>, vector<64x32xf32> -> vector<64x32xf32>
    %70 = arith.addf %67, %69 : vector<64x32xf32>
    %71 = vector.broadcast %10 : vector<1x32xf32> to vector<64x32xf32>
    %72 = arith.addf %70, %71 : vector<64x32xf32>
    %73 = vector.broadcast %17 : vector<64x1xf32> to vector<64x32xf32>
    %74 = arith.mulf %72, %73 : vector<64x32xf32>
    %cst_38 = arith.constant dense<0.000000e+00> : vector<64x16xf32>
    %75 = tpu.matmul %74, %3, %cst_38 {dimension_numbers = #tpu.dot_dimension_numbers<[1], [0], [0], [1], [0, 0, 1, 1], [], []>} : vector<64x32xf32>, vector<32x16xf32>, vector<64x16xf32> -> vector<64x16xf32>
    %76 = vector.broadcast %11 : vector<1x16xf32> to vector<64x16xf32>
    %77 = arith.addf %75, %76 : vector<64x16xf32>
    %cst_39 = arith.constant 0.000000e+00 : f32
    %78 = vector.broadcast %cst_39 : f32 to vector<64x16xf32>
    %79 = arith.maximumf %77, %78 : vector<64x16xf32>
    %80 = vector.extract_strided_slice %16 {offsets = [0, 0], sizes = [8, 16], strides = [1, 1]} : vector<32x16xf32> to vector<8x16xf32>
    %81 = vector.extract_strided_slice %16 {offsets = [8, 0], sizes = [8, 16], strides = [1, 1]} : vector<32x16xf32> to vector<8x16xf32>
    %82 = vector.extract_strided_slice %79 {offsets = [0, 0], sizes = [32, 16], strides = [1, 1]} : vector<64x16xf32> to vector<32x16xf32>
    %83 = vector.extract_strided_slice %82 {offsets = [0, 0], sizes = [24, 16], strides = [1, 1]} : vector<32x16xf32> to vector<24x16xf32>
    %84 = tpu.concatenate %81, %83 in 0 : vector<8x16xf32>, vector<24x16xf32> -> vector<32x16xf32>
    %85 = vector.extract_strided_slice %82 {offsets = [0, 0], sizes = [16, 16], strides = [1, 1]} : vector<32x16xf32> to vector<16x16xf32>
    %86 = tpu.concatenate %80, %81, %85 in 0 : vector<8x16xf32>, vector<8x16xf32>, vector<16x16xf32> -> vector<32x16xf32>
    %87 = vector.extract_strided_slice %16 {offsets = [16, 0], sizes = [8, 16], strides = [1, 1]} : vector<32x16xf32> to vector<8x16xf32>
    %88 = vector.extract_strided_slice %16 {offsets = [24, 0], sizes = [8, 16], strides = [1, 1]} : vector<32x16xf32> to vector<8x16xf32>
    %89 = vector.extract_strided_slice %79 {offsets = [32, 0], sizes = [32, 16], strides = [1, 1]} : vector<64x16xf32> to vector<32x16xf32>
    %90 = vector.extract_strided_slice %89 {offsets = [0, 0], sizes = [24, 16], strides = [1, 1]} : vector<32x16xf32> to vector<24x16xf32>
    %91 = tpu.concatenate %88, %90 in 0 : vector<8x16xf32>, vector<24x16xf32> -> vector<32x16xf32>
    %92 = vector.extract_strided_slice %89 {offsets = [0, 0], sizes = [16, 16], strides = [1, 1]} : vector<32x16xf32> to vector<16x16xf32>
    %93 = tpu.concatenate %87, %88, %92 in 0 : vector<8x16xf32>, vector<8x16xf32>, vector<16x16xf32> -> vector<32x16xf32>
    %94 = tpu.concatenate %84, %91 in 0 : vector<32x16xf32>, vector<32x16xf32> -> vector<64x16xf32>
    %95 = tpu.concatenate %86, %93 in 0 : vector<32x16xf32>, vector<32x16xf32> -> vector<64x16xf32>
    %cst_40 = arith.constant dense<0.000000e+00> : vector<64x32xf32>
    %96 = tpu.matmul %95, %4, %cst_40 {dimension_numbers = #tpu.dot_dimension_numbers<[1], [0], [0], [1], [0, 0, 1, 1], [], []>} : vector<64x16xf32>, vector<16x32xf32>, vector<64x32xf32> -> vector<64x32xf32>
    %cst_41 = arith.constant dense<0.000000e+00> : vector<64x32xf32>
    %97 = tpu.matmul %94, %5, %cst_41 {dimension_numbers = #tpu.dot_dimension_numbers<[1], [0], [0], [1], [0, 0, 1, 1], [], []>} : vector<64x16xf32>, vector<16x32xf32>, vector<64x32xf32> -> vector<64x32xf32>
    %98 = arith.addf %96, %97 : vector<64x32xf32>
    %cst_42 = arith.constant dense<0.000000e+00> : vector<64x32xf32>
    %99 = tpu.matmul %79, %6, %cst_42 {dimension_numbers = #tpu.dot_dimension_numbers<[1], [0], [0], [1], [0, 0, 1, 1], [], []>} : vector<64x16xf32>, vector<16x32xf32>, vector<64x32xf32> -> vector<64x32xf32>
    %100 = arith.addf %98, %99 : vector<64x32xf32>
    %101 = vector.broadcast %12 : vector<1x32xf32> to vector<64x32xf32>
    %102 = arith.addf %100, %101 : vector<64x32xf32>
    %cst_43 = arith.constant 0.000000e+00 : f32
    %103 = vector.broadcast %cst_43 : f32 to vector<64x32xf32>
    %104 = arith.maximumf %102, %103 : vector<64x32xf32>
    %cst_44 = arith.constant dense<0.000000e+00> : vector<64x32xf32>
    %105 = tpu.matmul %104, %7, %cst_44 {dimension_numbers = #tpu.dot_dimension_numbers<[1], [0], [0], [1], [0, 0, 1, 1], [], []>} : vector<64x32xf32>, vector<32x32xf32>, vector<64x32xf32> -> vector<64x32xf32>
    %106 = vector.broadcast %13 : vector<1x32xf32> to vector<64x32xf32>
    %107 = arith.addf %105, %106 : vector<64x32xf32>
    %cst_45 = arith.constant 0.000000e+00 : f32
    %108 = vector.broadcast %cst_45 : f32 to vector<64x32xf32>
    %109 = arith.maximumf %107, %108 : vector<64x32xf32>
    %cst_46 = arith.constant dense<0.000000e+00> : vector<64x8xf32>
    %110 = tpu.matmul %109, %8, %cst_46 {dimension_numbers = #tpu.dot_dimension_numbers<[1], [0], [0], [1], [0, 0, 1, 1], [], []>} : vector<64x32xf32>, vector<32x8xf32>, vector<64x8xf32> -> vector<64x8xf32>
    %111 = vector.broadcast %14 : vector<1x8xf32> to vector<64x8xf32>
    %112 = arith.addf %110, %111 : vector<64x8xf32>
    %113 = vector.broadcast %17 : vector<64x1xf32> to vector<64x8xf32>
    %114 = arith.mulf %112, %113 : vector<64x8xf32>
    %c0_47 = arith.constant 0 : index
    %c0_48 = arith.constant 0 : index
    %115 = vector.load %arg3[%c0_47, %c0_48] : memref<64x24xf32, #tpu.memory_space<vmem>>, vector<64x16xf32>
    tpu.vector_store %arg3[%c0_47, %c0_48], %79 {strides = array<i32>} : memref<64x24xf32, #tpu.memory_space<vmem>>, vector<64x16xf32>,
    %c0_49 = arith.constant 0 : index
    %c16_50 = arith.constant 16 : index
    %116 = vector.load %arg3[%c0_49, %c16_50] : memref<64x24xf32, #tpu.memory_space<vmem>>, vector<64x8xf32>
    tpu.vector_store %arg3[%c0_49, %c16_50], %114 {strides = array<i32>} : memref<64x24xf32, #tpu.memory_space<vmem>>, vector<64x8xf32>,
    return
  }
}

</mosaic_0001>

<bundles_post_ra>
// kernel: agent_forward.1
= control target key start
LH: loop header
LB: loop body
LE: loop exit
PB: predicated region body
PF: predicated region fallthrough
CT: control target
= control target key end

     0   :  { %vm72_vm0 = vcmask 130048   ;;  %vm210_vm1 = vcmask 261120   ;;  %s3281_s15 = smov 80   ;;  %s3282_s16 = smov 112   ;;  %vm702_vm3 = vcmask 523264   ;;  %s3894_s2 = inlined_call_operand.vmem [shape: f32[232,128], index: 2, kind: input, shape index: {}]   ;;  %s3895_s0 = inlined_call_operand.vmem [shape: f32[160,16], index: 0, kind: input, shape index: {}]   ;;  %s3896_s1 = inlined_call_operand.vmem [shape: f32[64,128], index: 1, kind: input, shape index: {}]   ;;  %s3897_s3 = inlined_call_operand.vmem [shape: f32[64,24], index: 3, kind: output, shape index: {}]  }
   0x1   :  { %v14_v0 = vld [vmem:[%s3894_s2] sm:$0xff]  ;;  %v15_v1 = vld [vmem:[%s3894_s2 + $0x8] sm:$0xff]  ;;  %v16_v4 = vld [vmem:[%s3894_s2 + $0x10] sm:$0xff]  ;;  %s3283_s17 = smov 96   ;;  %s3284_s18 = smov 64  }
   0x2   :  { %v48_v2 = vld [vmem:[%s3895_s0] sm:$0xff]  ;;  %v2984_v3 = vpack.c.bf16 %v15_v1, %v14_v0  ;;  %v17_v5 = vld [vmem:[%s3894_s2 + $0x18] sm:$0xff]  ;;  %v49_v6 = vld [vmem:[%s3895_s0 + $0x8] sm:$0xff]  ;;  %s3285_s8 = smov 48  }
   0x3   :  { %2700 = vmatprep.mubr.msk.f32.mxu0 %vm72_vm0, %v48_v2  ;;  %v2988_v7 = vpack.c.bf16 %v17_v5, %v16_v4  ;;  %v50_v8 = vld [vmem:[%s3895_s0 + $0x10] sm:$0xff]  ;;  %v51_v9 = vld [vmem:[%s3895_s0 + $0x18] sm:$0xff]  ;;  %v52_v10 = vld [vmem:[%s3895_s0 + $0x20] sm:$0xff] }
   0x4   :  { %2985 = vmatprep.subr.bf16.mxu0 %v2984_v3  ;;  %v53_v11 = vld [vmem:[%s3895_s0 + $0x28] sm:$0xff]  ;;  %v54_v12 = vld [vmem:[%s3895_s0 + $0x30] sm:$0xff]  ;;  %v55_v13 = vld [vmem:[%s3895_s0 + $0x38] sm:$0xff] }
   0x5   :  { %2987 = vmatpush3.bf16.msra.mxu0 %v2984_v3  ;;  %2989 = vmatprep.subr.bf16.mxu1 %v2988_v7  ;;  %v18_v14 = vld [vmem:[%s3894_s2 + $0x20] sm:$0xff]  ;;  %v19_v15 = vld [vmem:[%s3894_s2 + $0x28] sm:$0xff]  ;;  %vm3416_vm2 = vmpackc.low %vm72_vm0, %vm72_vm0 }
   0x6   :  { %2991 = vmatpush3.bf16.msra.mxu1 %v2988_v7  ;;  %v2992_v16 = vpack.c.bf16 %v19_v15, %v18_v14  ;;  %v2390_v17 = vld [vmem:[%s3894_s2 + $0xe0] ss:$0 sm:$0xff] }
   0x8   :  { %2701 = vmatmul.mubr.msk.f32.vlgmr.msra.gmra.mrb[0].mxu0 %vm72_vm0, %v49_v6  ;;  %2993 = vmatprep.subr.bf16.mxu1 %v2992_v16 }
   0x9   :  { %2703 = vmatprep.mubr.msk.f32.mxu0 %vm72_vm0, %v50_v8 }
   0xa   :  { %2995 = vmatpush3.bf16.msra.mxu1 %v2992_v16 }
   0xc   :  { %2704 = vmatmul.mubr.msk.f32.gmra.mrb[2].mxu0 %vm72_vm0, %v51_v9 }
   0xd   :  { %2706 = vmatprep.mubr.msk.f32.mxu0 %vm72_vm0, %v52_v10 }
  0x10   :  { %2707 = vmatmul.mubr.msk.f32.gmra.mrb[4].mxu0 %vm72_vm0, %v53_v11 }
  0x11   :  { %2709 = vmatprep.mubr.msk.f32.mxu0 %vm72_vm0, %v54_v12 }
  0x14   :  { %2710 = vmatmul.mubr.msk.f32.gmra.mrb[6].mxu0 %vm72_vm0, %v55_v13 }
  0xdb   :  { %v2702_v18 = vpop.f32.mrb[0].mxu0 }
  0xdc   :  { %v169_v19 = vadd.f32 %v2702_v18, %v2390_v17  ;;  %v163_v20 = vpop.f32.mrb[1].mxu0 }
  0xdd   :  { %v164_v21 = vadd.f32 %v2390_v17, %v163_v20 }
  0xde   :  { %v203_v24 = vmax.f32 %v169_v19, 0.0 }
  0xdf   :  { %v202_v22 = vmax.f32 %v164_v21, 0.0  ;;  %v2705_v23 = vpop.f32.mrb[2].mxu0 }
  0xe0   :  { %v179_v25 = vadd.f32 %v2705_v23, %v2390_v17  ;;  %v173_v26 = vpop.f32.mrb[3].mxu0 }
  0xe1   :  { %v174_v27 = vadd.f32 %v2390_v17, %v173_v26  ;;  %2720 = vmatprep.mubr.msk.f32.mxu1 %vm210_vm1, %v202_v22 }
  0xe2   :  { %v205_v28 = vmax.f32 %v179_v25, 0.0  ;;  %2721 = vmatmul.mubr.msk.f32.vlgmr.msra.gmra.mrb[0].mxu1 %vm210_vm1, %v203_v24 }
  0xe3   :  { %v204_v29 = vmax.f32 %v174_v27, 0.0  ;;  %v2708_v30 = vpop.f32.mrb[4].mxu0 }
  0xe4   :  { %v189_v31 = vadd.f32 %v2708_v30, %v2390_v17  ;;  %v183_v32 = vpop.f32.mrb[5].mxu0 }
  0xe5   :  { %v184_v33 = vadd.f32 %v2390_v17, %v183_v32  ;;  %2723 = vmatprep.mubr.msk.f32.mxu1 %vm210_vm1, %v204_v29 }
  0xe6   :  { %v207_v34 = vmax.f32 %v189_v31, 0.0  ;;  %2724 = vmatmul.mubr.msk.f32.gmra.mrb[2].mxu1 %vm210_vm1, %v205_v28 }
  0xe7   :  { %v206_v35 = vmax.f32 %v184_v33, 0.0  ;;  %v2711_v36 = vpop.f32.mrb[6].mxu0 }
  0xe8   :  { %v199_v37 = vadd.f32 %v2711_v36, %v2390_v17  ;;  %v193_v38 = vpop.f32.mrb[7].mxu0 }
  0xe9   :  { %v194_v39 = vadd.f32 %v2390_v17, %v193_v38  ;;  %2726 = vmatprep.mubr.msk.f32.mxu1 %vm210_vm1, %v206_v35 }
  0xea   :  { %v209_v40 = vmax.f32 %v199_v37, 0.0  ;;  %2727 = vmatmul.mubr.msk.f32.gmra.mrb[4].mxu1 %vm210_vm1, %v207_v34 }
  0xeb   :  { %v208_v41 = vmax.f32 %v194_v39, 0.0 }
  0xed   :  { %2729 = vmatprep.mubr.msk.f32.mxu1 %vm210_vm1, %v208_v41 }
  0xee   :  { %2730 = vmatmul.mubr.msk.f32.gmra.mrb[6].mxu1 %vm210_vm1, %v209_v40 }
 0x1b5   :  { %v3369_v42 = vpop.f32.mrb[0].mxu1 }
 0x1b6   :  { %v301_v43 = vpop.f32.mrb[1].mxu1 }
 0x1b7   :  { %2748 = vmatprep.mubr.msk.f32.mxu0 %vm72_vm0, %v301_v43  ;;  %v3373_v44 = vpack.i.bf16 %v3369_v42, %v301_v43 }
 0x1b9   :  { %3152 = vrot.lane.b32.xlu0 %v3373_v44, %s3281_s15  ;;  %v3376_v45 = vpop.f32.mrb[2].mxu1 }
 0x1ba   :  { %v3378_v46 = vpop.f32.mrb[3].mxu1 }
 0x1bb   :  { %v3382_v47 = vpack.i.bf16 %v3376_v45, %v3378_v46 }
 0x1bd   :  { %3157 = vrot.lane.b32.xlu0 %v3382_v47, %s3281_s15  ;;  %v3385_v48 = vpop.f32.mrb[4].mxu1 }
 0x1be   :  { %v3387_v49 = vpop.f32.mrb[5].mxu1 }
 0x1bf   :  { %v3391_v50 = vpack.i.bf16 %v3385_v48, %v3387_v49 }
 0x1c1   :  { %501 = vrot.lane.b32.xlu0 %v301_v43, %s3282_s16  ;;  %3162 = vrot.lane.b32.xlu1 %v3391_v50, %s3281_s15  ;;  %v3394_v51 = vpop.f32.mrb[6].mxu1 }
 0x1c2   :  { %v3396_v52 = vpop.f32.mrb[7].mxu1 }
 0x1c3   :  { %v3400_v53 = vpack.i.bf16 %v3394_v51, %v3396_v52 }
 0x1c5   :  { %505 = vrot.lane.b32.xlu0 %v3378_v46, %s3282_s16  ;;  %3167 = vrot.lane.b32.xlu1 %v3400_v53, %s3281_s15 }
 0x1c9   :  { %509 = vrot.lane.b32.xlu0 %v3387_v49, %s3282_s16  ;;  %503 = vrot.lane.b32.xlu1 %v3369_v42, %s3282_s16 }
 0x1cd   :  { %513 = vrot.lane.b32.xlu0 %v3396_v52, %s3282_s16  ;;  %507 = vrot.lane.b32.xlu1 %v3376_v45, %s3282_s16 }
 0x1d1   :  { %3172 = vrot.lane.b32.xlu0 %v3373_v44, %s3283_s17  ;;  %511 = vrot.lane.b32.xlu1 %v3385_v48, %s3282_s16 }
 0x1d5   :  { %3182 = vrot.lane.b32.xlu0 %v3391_v50, %s3283_s17  ;;  %515 = vrot.lane.b32.xlu1 %v3394_v51, %s3282_s16 }
 0x1d9   :  { %3177 = vrot.lane.b32.xlu1 %v3382_v47, %s3283_s17 }
 0x1dd   :  { %3187 = vrot.lane.b32.xlu1 %v3400_v53, %s3283_s17  ;;  %s3287_s17 = smov 16  }
 0x22b   :  { %v3153_v54 = vpop.permute.xlu0 %3152 }
 0x22c   :  { %v3155_v55 = vunpack.i.h.bf16 %v3153_v54  ;;  %v3154_v56 = vunpack.i.l.bf16 %v3153_v54 }
 0x22e   :  { %v3020_v58 = vpack.c.bf16 %v3155_v55, %v3154_v56 }
 0x22f   :  { %v3158_v59 = vpop.permute.xlu0 %3157 }
 0x230   :  { %v3160_v60 = vunpack.i.h.bf16 %v3158_v59  ;;  %v3159_v61 = vunpack.i.l.bf16 %v3158_v59  ;;  %3022 = vmatprep.subr.msk.bf16.mxu1 %vm3416_vm2, %v3020_v58 }
 0x231   :  { %3025 = vmatpush3.bf16.xpose.msk.msra.mxu1 %vm3416_vm2, %v3020_v58 }
 0x232   :  { %v3026_v62 = vpack.c.bf16 %v3160_v60, %v3159_v61  ;;  %v713_v60 = vld [vmem:[%s3896_s1 + $0x10] sm:$0xff] }
 0x233   :  { %v502_v63 = vpop.permute.xlu0 %501  ;;  %v3163_v0 = vpop.permute.xlu1 %3162 }
 0x234   :  { %v3165_v1 = vunpack.i.h.bf16 %v3163_v0  ;;  %v3164_v2 = vunpack.i.l.bf16 %v3163_v0  ;;  %2776 = vmatprep.mubr.msk.f32.mxu1 %vm72_vm0, %v502_v63  ;;  %3028 = vmatprep.subr.msk.bf16.mxu1 %vm3416_vm2, %v3026_v62 }
 0x236   :  { %v3032_v3 = vpack.c.bf16 %v3165_v1, %v3164_v2  ;;  %v715_v2 = vld [vmem:[%s3896_s1 + $0x20] sm:$0xff] }
 0x237   :  { %v506_v4 = vpop.permute.xlu0 %505  ;;  %v3168_v5 = vpop.permute.xlu1 %3167 }
 0x238   :  { %v3170_v6 = vunpack.i.h.bf16 %v3168_v5  ;;  %v3169_v7 = vunpack.i.l.bf16 %v3168_v5 }
 0x239   :  { %3031 = vmatpush3.bf16.xpose.msk.msra.mxu1 %vm3416_vm2, %v3026_v62 }
 0x23a   :  { %3034 = vmatprep.subr.msk.bf16.mxu1 %vm3416_vm2, %v3032_v3  ;;  %v3038_v10 = vpack.c.bf16 %v3170_v6, %v3169_v7 }
 0x23b   :  { %v510_v8 = vpop.permute.xlu0 %509  ;;  %v504_v9 = vpop.permute.xlu1 %503 }
 0x23f   :  { %v514_v11 = vpop.permute.xlu0 %513  ;;  %v508_v12 = vpop.permute.xlu1 %507 }
 0x241   :  { %3037 = vmatpush3.bf16.xpose.msk.msra.mxu1 %vm3416_vm2, %v3032_v3  ;;  %v714_v3 = vld [vmem:[%s3896_s1 + $0x18] sm:$0xff] }
 0x242   :  { %3040 = vmatprep.subr.msk.bf16.mxu1 %vm3416_vm2, %v3038_v10 }
 0x243   :  { %v3173_v13 = vpop.permute.xlu0 %3172  ;;  %v512_v14 = vpop.permute.xlu1 %511 }
 0x244   :  { %v3175_v15 = vunpack.i.h.bf16 %v3173_v13  ;;  %v3174_v16 = vunpack.i.l.bf16 %v3173_v13 }
 0x246   :  { %v2996_v17 = vpack.c.bf16 %v3175_v15, %v3174_v16 }
 0x247   :  { %v516_v18 = vpop.permute.xlu1 %515  ;;  %v3183_v19 = vpop.permute.xlu0 %3182 }
 0x248   :  { %2998 = vmatprep.subr.msk.bf16.mxu0 %vm3416_vm2, %v2996_v17  ;;  %v3185_v21 = vunpack.i.h.bf16 %v3183_v19  ;;  %v3184_v22 = vunpack.i.l.bf16 %v3183_v19 }
 0x249   :  { %3001 = vmatpush3.bf16.xpose.msk.msra.mxu0 %vm3416_vm2, %v2996_v17  ;;  %3043 = vmatpush3.bf16.xpose.msk.msra.mxu1 %vm3416_vm2, %v3038_v10  ;;  %v717_v10 = vld [vmem:[%s3896_s1 + $0x30] sm:$0xff]  ;;  %v718_v17 = vld [vmem:[%s3896_s1 + $0x38] sm:$0xff] }
 0x24a   :  { %v3008_v26 = vpack.c.bf16 %v3185_v21, %v3184_v22 }
 0x24b   :  { %v3178_v20 = vpop.permute.xlu1 %3177 }
 0x24c   :  { %v3180_v23 = vunpack.i.h.bf16 %v3178_v20  ;;  %v3179_v24 = vunpack.i.l.bf16 %v3178_v20 }
 0x24e   :  { %v3002_v25 = vpack.c.bf16 %v3180_v23, %v3179_v24 }
 0x24f   :  { %v3188_v27 = vpop.permute.xlu1 %3187 }
 0x250   :  { %3004 = vmatprep.subr.msk.bf16.mxu0 %vm3416_vm2, %v3002_v25  ;;  %2777 = vmatmul.mubr.msk.f32.vlgmr.msra.gmra.mrb[8].mxu1 %vm72_vm0, %v504_v9  ;;  %v3190_v28 = vunpack.i.h.bf16 %v3188_v27  ;;  %v3189_v29 = vunpack.i.l.bf16 %v3188_v27  ;;  %v716_v9 = vld [vmem:[%s3896_s1 + $0x28] sm:$0xff] }
 0x251   :  { %3007 = vmatpush3.bf16.xpose.msk.msra.mxu0 %vm3416_vm2, %v3002_v25  ;;  %2779 = vmatprep.mubr.msk.f32.mxu1 %vm72_vm0, %v506_v4 }
 0x252   :  { %3010 = vmatprep.subr.msk.bf16.mxu0 %vm3416_vm2, %v3008_v26  ;;  %v3014_v30 = vpack.c.bf16 %v3190_v28, %v3189_v29 }
 0x254   :  { %2780 = vmatmul.mubr.msk.f32.gmra.mrb[10].mxu1 %vm72_vm0, %v508_v12 }
 0x255   :  { %2782 = vmatprep.mubr.msk.f32.mxu1 %vm72_vm0, %v510_v8 }
 0x258   :  { %2783 = vmatmul.mubr.msk.f32.gmra.mrb[12].mxu1 %vm72_vm0, %v512_v14 }
 0x259   :  { %3013 = vmatpush3.bf16.xpose.msk.msra.mxu0 %vm3416_vm2, %v3008_v26  ;;  %2785 = vmatprep.mubr.msk.f32.mxu1 %vm72_vm0, %v514_v11 }
 0x25a   :  { %3016 = vmatprep.subr.msk.bf16.mxu0 %vm3416_vm2, %v3014_v30 }
 0x25c   :  { %2786 = vmatmul.mubr.msk.f32.gmra.mrb[14].mxu1 %vm72_vm0, %v516_v18 }
 0x261   :  { %3019 = vmatpush3.bf16.xpose.msk.msra.mxu0 %vm3416_vm2, %v3014_v30 }
 0x268   :  { %2749 = vmatmul.mubr.msk.f32.vlgmr.msra.gmra.mrb[8].mxu0 %vm72_vm0, %v3369_v42 }
 0x269   :  { %2751 = vmatprep.mubr.msk.f32.mxu0 %vm72_vm0, %v3378_v46 }
 0x26c   :  { %2752 = vmatmul.mubr.msk.f32.gmra.mrb[10].mxu0 %vm72_vm0, %v3376_v45 }
 0x26d   :  { %2754 = vmatprep.mubr.msk.f32.mxu0 %vm72_vm0, %v3387_v49  ;;  %v712_v49 = vld [vmem:[%s3896_s1 + $0x8] sm:$0xff] }
 0x270   :  { %2755 = vmatmul.mubr.msk.f32.gmra.mrb[12].mxu0 %vm72_vm0, %v3385_v48 }
 0x271   :  { %2757 = vmatprep.mubr.msk.f32.mxu0 %vm72_vm0, %v3396_v52  ;;  %v711_v52 = vld [vmem:[%s3896_s1] sm:$0xff] }
 0x274   :  { %2758 = vmatmul.mubr.msk.f32.gmra.mrb[14].mxu0 %vm72_vm0, %v3394_v51 }
 0x323   :  { %v2778_v31 = vpop.f32.mrb[8].mxu1 }
 0x324   :  { %680 = vrot.lane.b32.xlu1 %v2778_v31, %s3284_s18  ;;  %v631_v32 = vpop.f32.mrb[9].mxu1 }
 0x325   :  { %678 = vrot.lane.b32.xlu0 %v631_v32, %s3284_s18 }
 0x327   :  { %v2781_v33 = vpop.f32.mrb[10].mxu1 }
 0x328   :  { %684 = vrot.lane.b32.xlu1 %v2781_v33, %s3284_s18  ;;  %v641_v34 = vpop.f32.mrb[11].mxu1 }
 0x329   :  { %682 = vrot.lane.b32.xlu0 %v641_v34, %s3284_s18 }
 0x32b   :  { %v2784_v35 = vpop.f32.mrb[12].mxu1 }
 0x32c   :  { %688 = vrot.lane.b32.xlu1 %v2784_v35, %s3284_s18  ;;  %v651_v36 = vpop.f32.mrb[13].mxu1 }
 0x32d   :  { %686 = vrot.lane.b32.xlu0 %v651_v36, %s3284_s18 }
 0x32f   :  { %v2787_v37 = vpop.f32.mrb[14].mxu1 }
 0x330   :  { %692 = vrot.lane.b32.xlu1 %v2787_v37, %s3284_s18  ;;  %v661_v38 = vpop.f32.mrb[15].mxu1 }
 0x331   :  { %690 = vrot.lane.b32.xlu0 %v661_v38, %s3284_s18 }
 0x33b   :  { %v2750_v39 = vpop.f32.mrb[8].mxu0 }
 0x33c   :  { %v462_v40 = vpop.f32.mrb[9].mxu0 }
 0x33f   :  { %v2753_v41 = vpop.f32.mrb[10].mxu0 }
 0x340   :  { %v472_v42 = vpop.f32.mrb[11].mxu0 }
 0x343   :  { %v2756_v43 = vpop.f32.mrb[12].mxu0 }
 0x344   :  { %v482_v45 = vpop.f32.mrb[13].mxu0 }
 0x347   :  { %v2759_v46 = vpop.f32.mrb[14].mxu0 }
 0x348   :  { %v492_v48 = vpop.f32.mrb[15].mxu0 }
 0x396   :  { %v681_v51 = vpop.permute.xlu1 %680 }
 0x397   :  { %v704_v54 = vsel %vm702_vm3, %v2750_v39, %v681_v51  ;;  %v679_v55 = vpop.permute.xlu0 %678 }
 0x398   :  { %v703_v56 = vsel %vm702_vm3, %v462_v40, %v679_v55  ;;  %v720_v57 = vadd.f32 %v712_v49, %v704_v54 }
 0x399   :  { %v719_v58 = vadd.f32 %v711_v52, %v703_v56 }
 0x39a   :  { %v685_v59 = vpop.permute.xlu1 %684  ;;  %729 = vmax.xlane.f32.xlu1 %v720_v57 }
 0x39b   :  { %v683_v61 = vpop.permute.xlu0 %682  ;;  %727 = vmax.xlane.f32.xlu0 %v719_v58  ;;  %v706_v0 = vsel %vm702_vm3, %v2753_v41, %v685_v59 }
 0x39c   :  { %v705_v62 = vsel %vm702_vm3, %v472_v42, %v683_v61  ;;  %v722_v7 = vadd.f32 %v714_v3, %v706_v0 }
 0x39d   :  { %v721_v63 = vadd.f32 %v713_v60, %v705_v62 }
 0x39e   :  { %v689_v1 = vpop.permute.xlu1 %688 }
 0x39f   :  { %v687_v4 = vpop.permute.xlu0 %686  ;;  %731 = vmax.xlane.f32.xlu0 %v721_v63  ;;  %v708_v8 = vsel %vm702_vm3, %v2756_v43, %v689_v1 }
 0x3a0   :  { %v707_v5 = vsel %vm702_vm3, %v482_v45, %v687_v4  ;;  %v724_v14 = vadd.f32 %v716_v9, %v708_v8 }
 0x3a1   :  { %v723_v6 = vadd.f32 %v715_v2, %v707_v5 }
 0x3a2   :  { %v693_v11 = vpop.permute.xlu1 %692 }
 0x3a3   :  { %735 = vmax.xlane.f32.xlu1 %v723_v6  ;;  %733 = vmax.xlane.f32.xlu0 %v722_v7  ;;  %v691_v12 = vpop.permute.xlu0 %690  ;;  %v710_v16 = vsel %vm702_vm3, %v2759_v46, %v693_v11 }
 0x3a4   :  { %v709_v13 = vsel %vm702_vm3, %v492_v48, %v691_v12  ;;  %v3517_v18 = vadd.f32 %v718_v17, %v710_v16 }
 0x3a5   :  { %v3510_v15 = vadd.f32 %v717_v10, %v709_v13 }
 0x3a7   :  { %737 = vmax.xlane.f32.xlu0 %v724_v14  ;;  %739 = vmax.xlane.f32.xlu1 %v3510_v15 }
 0x3ab   :  { %741 = vmax.xlane.f32.xlu0 %v3517_v18 }
 0x3b8   :  { %3192 = vrot.lane.b32.xlu1 %v3373_v44, %s3285_s8 }
 0x3bc   :  { %3202 = vrot.lane.b32.xlu1 %v3391_v50, %s3285_s8 }
 0x3c0   :  { %3207 = vrot.lane.b32.xlu1 %v3400_v53, %s3285_s8 }
 0x3c1   :  { %3197 = vrot.lane.b32.xlu0 %v3382_v47, %s3285_s8 }
 0x3c4   :  { %3217 = vrot.lane.b32.xlu1 %v3382_v47, %s3284_s18 }
 0x3c5   :  { %3212 = vrot.lane.b32.xlu0 %v3373_v44, %s3284_s18 }
 0x3c9   :  { %3222 = vrot.lane.b32.xlu0 %v3391_v50, %s3284_s18 }
 0x427   :  { %v730_v19 = vpop.xlane.xlu1 %729 }
 0x428   :  { %vm744_vm4 = vcmp.le.f32.partialorder %v730_v19, -5e+29  ;;  %v728_v20 = vpop.xlane.xlu0 %727 }
 0x429   :  { %v752_v21 = vsel %vm744_vm4, 0.0, %v730_v19  ;;  %vm743_vm5 = vcmp.le.f32.partialorder %v728_v20, -5e+29 }
 0x42a   :  { %v760_v22 = vsub.f32 %v720_v57, %v752_v21  ;;  %v751_v23 = vsel %vm743_vm5, 0.0, %v728_v20 }
 0x42b   :  { %v759_v24 = vsub.f32 %v719_v58, %v751_v23 }
 0x42c   :  { %v769_v25 = vmul.f32 1.442695, %v760_v22  ;;  %v732_v26 = vpop.xlane.xlu0 %731 }
 0x42d   :  { %v767_v27 = vmul.f32 1.442695, %v759_v24  ;;  %vm745_vm6 = vcmp.le.f32.partialorder %v732_v26, -5e+29 }
 0x42e   :  { %3233 = vpow2.f32 %v769_v25  ;;  %v753_v47 = vsel %vm745_vm6, 0.0, %v732_v26 }
 0x42f   :  { %3235 = vpow2.f32 %v767_v27  ;;  %v761_v28 = vsub.f32 %v721_v63, %v753_v47 }
 0x430   :  { %v736_v44 = vpop.xlane.xlu1 %735  ;;  %v734_v29 = vpop.xlane.xlu0 %733 }
 0x431   :  { %v771_v30 = vmul.f32 1.442695, %v761_v28  ;;  %vm747_vm7 = vcmp.le.f32.partialorder %v736_v44, -5e+29  ;;  %vm746_vm8 = vcmp.le.f32.partialorder %v734_v29, -5e+29 }
 0x432   :  { %v755_v50 = vsel %vm747_vm7, 0.0, %v736_v44  ;;  %v754_v31 = vsel %vm746_vm8, 0.0, %v734_v29 }
 0x433   :  { %3237 = vpow2.f32 %v771_v30  ;;  %v763_v32 = vsub.f32 %v723_v6, %v755_v50  ;;  %v762_v33 = vsub.f32 %v722_v7, %v754_v31 }
 0x434   :  { %v740_v34 = vpop.xlane.xlu1 %739  ;;  %v738_v35 = vpop.xlane.xlu0 %737 }
 0x435   :  { %v773_v36 = vmul.f32 1.442695, %v762_v33  ;;  %vm749_vm9 = vcmp.le.f32.partialorder %v740_v34, -5e+29  ;;  %vm748_vm10 = vcmp.le.f32.partialorder %v738_v35, -5e+29 }
 0x436   :  { %v757_v37 = vsel %vm749_vm9, 0.0, %v740_v34  ;;  %v775_v38 = vmul.f32 1.442695, %v763_v32  ;;  %v756_v39 = vsel %vm748_vm10, 0.0, %v738_v35 }
 0x437   :  { %3239 = vpow2.f32 %v773_v36  ;;  %v765_v41 = vsub.f32 %v3510_v15, %v757_v37  ;;  %v764_v42 = vsub.f32 %v724_v14, %v756_v39 }
 0x438   :  { %v3530_v40 = vpop.eup %3233  ;;  %v3193_v43 = vpop.permute.xlu1 %3192  ;;  %3241 = vpow2.f32 %v775_v38 }
 0x439   :  { %v742_v45 = vpop.xlane.xlu0 %741  ;;  %v3533_v46 = vpop.eup %3235  ;;  %v3195_v48 = vunpack.i.h.bf16 %v3193_v43  ;;  %v3194_v49 = vunpack.i.l.bf16 %v3193_v43  ;;  %817 = vrot.lane.b32.xlu0 %v3530_v40, %s3284_s18  ;;  %v777_v51 = vmul.f32 1.442695, %v764_v42  ;;  %v779_v55 = vmul.f32 1.442695, %v765_v41 }
 0x43a   :  { %vm750_vm11 = vcmp.le.f32.partialorder %v742_v45, -5e+29  ;;  %815 = vrot.lane.b32.xlu1 %v3533_v46, %s3284_s18  ;;  %2804 = vmatprep.mubr.msk.f32.mxu0 %vm702_vm3, %v3533_v46  ;;  %v783_v41 = vsel %vm702_vm3, %v3533_v46, 0.0  ;;  %v786_v42 = vsel %vm702_vm3, %v3530_v40, 0.0 }
 0x43b   :  { %v758_v52 = vsel %vm750_vm11, 0.0, %v742_v45  ;;  %v3060_v54 = vpack.c.bf16 %v3195_v48, %v3194_v49  ;;  %3243 = vpow2.f32 %v777_v51  ;;  %v22_v51 = vld [vmem:[%s3894_s2 + $0x40] sm:$0xff] }
 0x43c   :  { %v766_v56 = vsub.f32 %v3517_v18, %v758_v52  ;;  %v3203_v57 = vpop.permute.xlu1 %3202  ;;  %3245 = vpow2.f32 %v779_v55  ;;  %v23_v52 = vld [vmem:[%s3894_s2 + $0x48] sm:$0xff]  ;;  %v20_v55 = vld [vmem:[%s3894_s2 + $0x30] sm:$0xff] }
 0x43d   :  { %v3198_v58 = vpop.permute.xlu0 %3197  ;;  %v3542_v59 = vpop.eup %3237  ;;  %3061 = vmatprep.subr.bf16.mxu1 %v3060_v54  ;;  %v3205_v61 = vunpack.i.h.bf16 %v3203_v57  ;;  %v3204_v62 = vunpack.i.l.bf16 %v3203_v57 }
 0x43e   :  { %v3200_v60 = vunpack.i.h.bf16 %v3198_v58  ;;  %v3199_v63 = vunpack.i.l.bf16 %v3198_v58  ;;  %3063 = vmatpush3.bf16.msra.mxu1 %v3060_v54  ;;  %819 = vrot.lane.b32.xlu0 %v3542_v59, %s3284_s18  ;;  %v781_v0 = vmul.f32 1.442695, %v766_v56  ;;  %v789_v43 = vsel %vm702_vm3, %v3542_v59, 0.0  ;;  %v21_v56 = vld [vmem:[%s3894_s2 + $0x38] sm:$0xff]  ;;  %v60_v58 = vld [vmem:[%s3895_s0 + $0x60] sm:$0xff] }
 0x43f   :  { %v3068_v7 = vpack.c.bf16 %v3205_v61, %v3204_v62  ;;  %v3076_v54 = vpack.c.bf16 %v23_v52, %v22_v51  ;;  %v3621_v57 = vpack.c.bf16 %v21_v56, %v20_v55  ;;  %v62_v61 = vld [vmem:[%s3895_s0 + $0x70] sm:$0xff]  ;;  %v63_v62 = vld [vmem:[%s3895_s0 + $0x78] sm:$0xff] }
 0x440   :  { %v3064_v1 = vpack.c.bf16 %v3200_v60, %v3199_v63  ;;  %v3208_v2 = vpop.permute.xlu1 %3207  ;;  %3247 = vpow2.f32 %v781_v0  ;;  %v61_v60 = vld [vmem:[%s3895_s0 + $0x68] sm:$0xff]  ;;  %v64_v63 = vld [vmem:[%s3895_s0 + $0x80] sm:$0xff] }
 0x441   :  { %v3213_v3 = vpop.permute.xlu0 %3212  ;;  %v3546_v6 = vpop.eup %3239  ;;  %v3210_v8 = vunpack.i.h.bf16 %v3208_v2  ;;  %v3209_v9 = vunpack.i.l.bf16 %v3208_v2  ;;  %v65_v0 = vld [vmem:[%s3895_s0 + $0x88] sm:$0xff]  ;;  %v24_v2 = vld [vmem:[%s3894_s2 + $0x50] sm:$0xff] }
 0x442   :  { %v3215_v4 = vunpack.i.h.bf16 %v3213_v3  ;;  %v3214_v5 = vunpack.i.l.bf16 %v3213_v3  ;;  %3065 = vmatprep.subr.bf16.mxu1 %v3064_v1  ;;  %821 = vrot.lane.b32.xlu1 %v3546_v6, %s3284_s18  ;;  %v3550_v13 = vpop.eup %3241  ;;  %v792_v45 = vsel %vm702_vm3, %v3546_v6, 0.0  ;;  %v25_v3 = vld [vmem:[%s3894_s2 + $0x58] sm:$0xff] }
 0x443   :  { %3067 = vmatpush3.bf16.msra.mxu1 %v3064_v1  ;;  %v3072_v19 = vpack.c.bf16 %v3210_v8, %v3209_v9  ;;  %v795_v46 = vsel %vm702_vm3, %v3550_v13, 0.0  ;;  %v66_v1 = vld [vmem:[%s3895_s0 + $0x90] sm:$0xff] }
 0x444   :  { %v3044_v10 = vpack.c.bf16 %v3215_v4, %v3214_v5  ;;  %3069 = vmatprep.subr.bf16.mxu1 %v3068_v7  ;;  %v3218_v11 = vpop.permute.xlu1 %3217  ;;  %v3084_v4 = vpack.c.bf16 %v25_v3, %v24_v2  ;;  %v67_v5 = vld [vmem:[%s3895_s0 + $0x98] sm:$0xff] }
 0x445   :  { %v3223_v12 = vpop.permute.xlu0 %3222  ;;  %v3220_v14 = vunpack.i.h.bf16 %v3218_v11  ;;  %v3219_v15 = vunpack.i.l.bf16 %v3218_v11  ;;  %v3552_v16 = vpop.eup %3243 }
 0x446   :  { %3045 = vmatprep.subr.bf16.mxu0 %v3044_v10  ;;  %v3225_v17 = vunpack.i.h.bf16 %v3223_v12  ;;  %v3224_v18 = vunpack.i.l.bf16 %v3223_v12  ;;  %823 = vrot.lane.b32.xlu1 %v3550_v13, %s3284_s18  ;;  %v3558_v21 = vpop.eup %3245 }
 0x447   :  { %3047 = vmatpush3.bf16.msra.mxu0 %v3044_v10  ;;  %v3048_v20 = vpack.c.bf16 %v3220_v14, %v3219_v15  ;;  %825 = vrot.lane.b32.xlu0 %v3552_v16, %s3284_s18  ;;  %v801_v48 = vsel %vm702_vm3, %v3558_v21, 0.0 }
 0x448   :  { %3071 = vmatpush3.bf16.msra.mxu1 %v3068_v7  ;;  %v3052_v22 = vpack.c.bf16 %v3225_v17, %v3224_v18  ;;  %v27_v7 = vld [vmem:[%s3894_s2 + $0x68] sm:$0xff] }
 0x449   :  { %3073 = vmatprep.subr.bf16.mxu1 %v3072_v19  ;;  %3049 = vmatprep.subr.bf16.mxu0 %v3048_v20 }
 0x44a   :  { %3227 = vrot.lane.b32.xlu1 %v3400_v53, %s3284_s18  ;;  %v3248_v23 = vpop.eup %3247 }
 0x44b   :  { %3051 = vmatpush3.bf16.msra.mxu0 %v3048_v20  ;;  %827 = vrot.lane.b32.xlu0 %v3558_v21, %s3284_s18  ;;  %v804_v49 = vsel %vm702_vm3, %v3248_v23, 0.0 }
 0x44c   :  { %3075 = vmatpush3.bf16.msra.mxu1 %v3072_v19  ;;  %3053 = vmatprep.subr.bf16.mxu0 %v3052_v22 }
 0x44d   :  { %3085 = vmatprep.subr.bf16.mxu1 %v3084_v4 }
 0x44e   :  { %829 = vrot.lane.b32.xlu1 %v3248_v23, %s3284_s18 }
 0x44f   :  { %3055 = vmatpush3.bf16.msra.mxu0 %v3052_v22 }
 0x4ab   :  { %v818_v24 = vpop.permute.xlu0 %817 }
 0x4ac   :  { %v816_v25 = vpop.permute.xlu1 %815  ;;  %v842_v26 = vsel %vm702_vm3, %v818_v24, 0.0 }
 0x4ad   :  { %2832 = vmatprep.mubr.msk.f32.mxu1 %vm702_vm3, %v816_v25  ;;  %843 = vadd.xlane.f32.xlu1 %v842_v26  ;;  %v839_v27 = vsel %vm702_vm3, %v816_v25, 0.0 }
 0x4ae   :  { %840 = vadd.xlane.f32.xlu0 %v839_v27  ;;  %2833 = vmatmul.mubr.msk.f32.vlgmr.msra.gmra.mrb[16].mxu1 %vm702_vm3, %v818_v24 }
 0x4af   :  { %3087 = vmatpush3.bf16.msra.mxu1 %v3084_v4 }
 0x4b0   :  { %v820_v53 = vpop.permute.xlu0 %819 }
 0x4b1   :  { %2835 = vmatprep.mubr.msk.f32.mxu1 %vm702_vm3, %v820_v53  ;;  %v845_v47 = vsel %vm702_vm3, %v820_v53, 0.0 }
 0x4b2   :  { %846 = vadd.xlane.f32.xlu0 %v845_v47 }
 0x4b4   :  { %v822_v28 = vpop.permute.xlu1 %821 }
 0x4b5   :  { %2836 = vmatmul.mubr.msk.f32.gmra.mrb[18].mxu1 %vm702_vm3, %v822_v28  ;;  %v848_v44 = vsel %vm702_vm3, %v822_v28, 0.0 }
 0x4b6   :  { %849 = vadd.xlane.f32.xlu0 %v848_v44 }
 0x4b8   :  { %v824_v29 = vpop.permute.xlu1 %823 }
 0x4b9   :  { %v826_v30 = vpop.permute.xlu0 %825  ;;  %2838 = vmatprep.mubr.msk.f32.mxu1 %vm702_vm3, %v824_v29  ;;  %v851_v50 = vsel %vm702_vm3, %v824_v29, 0.0 }
 0x4ba   :  { %v854_v31 = vsel %vm702_vm3, %v826_v30, 0.0  ;;  %852 = vadd.xlane.f32.xlu1 %v851_v50  ;;  %2839 = vmatmul.mubr.msk.f32.gmra.mrb[20].mxu1 %vm702_vm3, %v826_v30 }
 0x4bb   :  { %855 = vadd.xlane.f32.xlu0 %v854_v31 }
 0x4bc   :  { %v3228_v32 = vpop.permute.xlu1 %3227 }
 0x4bd   :  { %v828_v33 = vpop.permute.xlu0 %827  ;;  %v3230_v34 = vunpack.i.h.bf16 %v3228_v32  ;;  %v3229_v35 = vunpack.i.l.bf16 %v3228_v32 }
 0x4be   :  { %2841 = vmatprep.mubr.msk.f32.mxu1 %vm702_vm3, %v828_v33  ;;  %v857_v36 = vsel %vm702_vm3, %v828_v33, 0.0 }
 0x4bf   :  { %858 = vadd.xlane.f32.xlu1 %v857_v36  ;;  %v3056_v37 = vpack.c.bf16 %v3230_v34, %v3229_v35 }
 0x4c0   :  { %v830_v38 = vpop.permute.xlu1 %829 }
 0x4c1   :  { %3057 = vmatprep.subr.bf16.mxu0 %v3056_v37  ;;  %2842 = vmatmul.mubr.msk.f32.gmra.mrb[22].mxu1 %vm702_vm3, %v830_v38  ;;  %v860_v39 = vsel %vm702_vm3, %v830_v38, 0.0 }
 0x4c2   :  { %861 = vadd.xlane.f32.xlu0 %v860_v39  ;;  %3059 = vmatpush3.bf16.msra.mxu0 %v3056_v37 }
 0x4c3   :  { %784 = vadd.xlane.f32.xlu1 %v783_v41  ;;  %3077 = vmatprep.subr.bf16.mxu0 %v3076_v54 }
 0x4c5   :  { %2805 = vmatmul.mubr.msk.f32.vlgmr.msra.gmra.mrb[16].mxu0 %vm702_vm3, %v3530_v40  ;;  %v798_v40 = vsel %vm702_vm3, %v3552_v16, 0.0 }
 0x4c6   :  { %787 = vadd.xlane.f32.xlu0 %v786_v42  ;;  %2807 = vmatprep.mubr.msk.f32.mxu0 %vm702_vm3, %v3542_v59  ;;  %v3286_v59 = vmov 0  }
 0x4c7   :  { %790 = vadd.xlane.f32.xlu1 %v789_v43  ;;  %3079 = vmatpush3.bf16.msra.mxu0 %v3076_v54 }
 0x4c8   :  { %3081 = vmatprep.subr.bf16.mxu0 %v3621_v57  ;;  %3231 = vset.pattern.permute.xlu1 %v3286_v59 }
 0x4c9   :  { %2808 = vmatmul.mubr.msk.f32.gmra.mrb[18].mxu0 %vm702_vm3, %v3546_v6  ;;  %3232 = vset.pattern.permute.xlu0 %v3286_v59  ;;  %v26_v6 = vld [vmem:[%s3894_s2 + $0x60] sm:$0xff] }
 0x4ca   :  { %793 = vadd.xlane.f32.xlu0 %v792_v45  ;;  %2810 = vmatprep.mubr.msk.f32.mxu0 %vm702_vm3, %v3550_v13  ;;  %v3088_v8 = vpack.c.bf16 %v27_v7, %v26_v6 }
 0x4cb   :  { %796 = vadd.xlane.f32.xlu1 %v795_v46 }
 0x4cc   :  { %3089 = vmatprep.subr.bf16.mxu1 %v3088_v8 }
 0x4cd   :  { %2811 = vmatmul.mubr.msk.f32.gmra.mrb[20].mxu0 %vm702_vm3, %v3552_v16  ;;  %3091 = vmatpush3.bf16.msra.mxu1 %v3088_v8 }
 0x4ce   :  { %799 = vadd.xlane.f32.xlu0 %v798_v40  ;;  %2813 = vmatprep.mubr.msk.f32.mxu0 %vm702_vm3, %v3558_v21 }
 0x4cf   :  { %802 = vadd.xlane.f32.xlu1 %v801_v48 }
 0x4d1   :  { %2814 = vmatmul.mubr.msk.f32.gmra.mrb[22].mxu0 %vm702_vm3, %v3248_v23 }
 0x4d2   :  { %805 = vadd.xlane.f32.xlu0 %v804_v49 }
 0x4e0   :  { %1489 = vperm.xlu1 %3231, %v60_v58  }
 0x4e4   :  { %1499 = vperm.xlu1 %3231, %v62_v61  }
 0x4e8   :  { %1494 = vperm.xlu0 %3232, %v61_v60   ;;  %1504 = vperm.xlu1 %3231, %v63_v62  }
 0x4ec   :  { %1509 = vperm.xlu1 %3231, %v64_v63  }
 0x4f0   :  { %1514 = vperm.xlu1 %3231, %v65_v0  }
 0x4f4   :  { %1519 = vperm.xlu1 %3231, %v66_v1  }
 0x4f8   :  { %1524 = vperm.xlu1 %3231, %v67_v5  }
 0x53a   :  { %v844_v11 = vpop.xlane.xlu1 %843 }
 0x53b   :  { %v841_v9 = vpop.xlane.xlu0 %840  ;;  %vm888_vm13 = vcmp.gt.f32.partialorder %v844_v11, 0.0 }
 0x53c   :  { %vm887_vm12 = vcmp.gt.f32.partialorder %v841_v9, 0.0  ;;  %v896_v14 = vsel %vm888_vm13, %v844_v11, 1.0 }
 0x53d   :  { %v895_v13 = vsel %vm887_vm12, %v841_v9, 1.0 }
 0x53e   :  { %3249 = vrcp.f32 %v895_v13 }
 0x53f   :  { %v847_v10 = vpop.xlane.xlu0 %846  ;;  %3251 = vrcp.f32 %v896_v14 }
 0x540   :  { %vm889_vm14 = vcmp.gt.f32.partialorder %v847_v10, 0.0 }
 0x541   :  { %v897_v18 = vsel %vm889_vm14, %v847_v10, 1.0 }
 0x542   :  { %3253 = vrcp.f32 %v897_v18 }
 0x543   :  { %v850_v12 = vpop.xlane.xlu0 %849 }
 0x544   :  { %vm890_vm15 = vcmp.gt.f32.partialorder %v850_v12, 0.0 }
 0x545   :  { %v898_v20 = vsel %vm890_vm15, %v850_v12, 1.0 }
 0x546   :  { %3255 = vrcp.f32 %v898_v20 }
 0x547   :  { %v853_v15 = vpop.xlane.xlu1 %852 }
 0x548   :  { %v856_v16 = vpop.xlane.xlu0 %855  ;;  %vm891_vm2 = vcmp.gt.f32.partialorder %v853_v15, 0.0  ;;  %v3250_v22 = vpop.eup %3249 }
 0x549   :  { %vm892_vm3 = vcmp.gt.f32.partialorder %v856_v16, 0.0  ;;  %v3252_v25 = vpop.eup %3251  ;;  %v899_v26 = vsel %vm891_vm2, %v853_v15, 1.0 }
 0x54a   :  { %v900_v47 = vsel %vm892_vm3, %v856_v16, 1.0  ;;  %3257 = vrcp.f32 %v899_v26  ;;  %v31_v26 = vld [vmem:[%s3894_s2 + $0x88] sm:$0xff] }
 0x54b   :  { %3259 = vrcp.f32 %v900_v47 }
 0x54c   :  { %v859_v17 = vpop.xlane.xlu1 %858  ;;  %v3254_v31 = vpop.eup %3253 }
 0x54d   :  { %vm893_vm4 = vcmp.gt.f32.partialorder %v859_v17, 0.0 }
 0x54e   :  { %v901_v29 = vsel %vm893_vm4, %v859_v17, 1.0 }
 0x54f   :  { %v862_v19 = vpop.xlane.xlu0 %861  ;;  %3261 = vrcp.f32 %v901_v29  ;;  %v2471_v29 = vld [vmem:[%s3894_s2 + $0xe1] ss:$0 sm:$0xff] }
 0x550   :  { %v785_v23 = vpop.xlane.xlu1 %784  ;;  %vm894_vm5 = vcmp.gt.f32.partialorder %v862_v19, 0.0  ;;  %v3256_v34 = vpop.eup %3255 }
 0x551   :  { %v902_v32 = vsel %vm894_vm5, %v862_v19, 1.0  ;;  %vm863_vm6 = vcmp.gt.f32.partialorder %v785_v23, 0.0 }
 0x552   :  { %3263 = vrcp.f32 %v902_v32  ;;  %v871_v37 = vsel %vm863_vm6, %v785_v23, 1.0 }
 0x553   :  { %v788_v27 = vpop.xlane.xlu0 %787  ;;  %3265 = vrcp.f32 %v871_v37 }
 0x554   :  { %v791_v44 = vpop.xlane.xlu1 %790  ;;  %vm864_vm7 = vcmp.gt.f32.partialorder %v788_v27, 0.0  ;;  %v3258_v43 = vpop.eup %3257 }
 0x555   :  { %vm865_vm8 = vcmp.gt.f32.partialorder %v791_v44, 0.0  ;;  %v872_v39 = vsel %vm864_vm7, %v788_v27, 1.0  ;;  %v3260_v46 = vpop.eup %3259 }
 0x556   :  { %v873_v48 = vsel %vm865_vm8, %v791_v44, 1.0  ;;  %3267 = vrcp.f32 %v872_v39 }
 0x557   :  { %v794_v30 = vpop.xlane.xlu0 %793  ;;  %3269 = vrcp.f32 %v873_v48 }
 0x558   :  { %v797_v38 = vpop.xlane.xlu1 %796  ;;  %vm866_vm9 = vcmp.gt.f32.partialorder %v794_v30, 0.0 }
 0x559   :  { %vm867_vm10 = vcmp.gt.f32.partialorder %v797_v38, 0.0  ;;  %v874_v51 = vsel %vm866_vm9, %v794_v30, 1.0  ;;  %v3262_v56 = vpop.eup %3261 }
 0x55a   :  { %3271 = vrcp.f32 %v874_v51 }
 0x55b   :  { %v800_v41 = vpop.xlane.xlu0 %799 }
 0x55c   :  { %v803_v52 = vpop.xlane.xlu1 %802  ;;  %vm868_vm11 = vcmp.gt.f32.partialorder %v800_v41, 0.0  ;;  %v3264_v59 = vpop.eup %3263 }
 0x55d   :  { %vm869_vm12 = vcmp.gt.f32.partialorder %v803_v52, 0.0  ;;  %v876_v60 = vsel %vm868_vm11, %v800_v41, 1.0  ;;  %v3266_v1 = vpop.eup %3265 }
 0x55e   :  { %v877_v63 = vsel %vm869_vm12, %v803_v52, 1.0 }
 0x55f   :  { %v806_v54 = vpop.xlane.xlu0 %805 }
 0x560   :  { %vm870_vm13 = vcmp.gt.f32.partialorder %v806_v54, 0.0  ;;  %v3268_v4 = vpop.eup %3267 }
 0x561   :  { %v878_v2 = vsel %vm870_vm13, %v806_v54, 1.0  ;;  %v3270_v8 = vpop.eup %3269 }
 0x564   :  { %v3272_v10 = vpop.eup %3271 }
 0x581   :  { %v2834_v21 = vpop.f32.mrb[16].mxu1 }
 0x582   :  { %v1170_v24 = vpop.f32.mrb[17].mxu1  ;;  %v1210_v28 = vmul.f32 %v3252_v25, %v2834_v21  ;;  %v30_v25 = vld [vmem:[%s3894_s2 + $0x80] sm:$0xff] }
 0x583   :  { %v1209_v53 = vmul.f32 %v3250_v22, %v1170_v24  ;;  %v3092_v27 = vpack.c.bf16 %v31_v26, %v30_v25 }
 0x585   :  { %2848 = vmatprep.mubr.msk.f32.mxu0 %vm72_vm0, %v1209_v53  ;;  %3093 = vmatprep.subr.bf16.mxu1 %v3092_v27  ;;  %v3683_v53 = vpop.permute.xlu1 %1489 }
 0x586   :  { %2849 = vmatmul.mubr.msk.f32.vlgmr.msra.gmra.mrb[24].mxu0 %vm72_vm0, %v1210_v28 }
 0x587   :  { %3083 = vmatpush3.bf16.msra.mxu0 %v3621_v57  ;;  %v875_v57 = vsel %vm867_vm10, %v797_v38, 1.0 }
 0x588   :  { %v2837_v50 = vpop.f32.mrb[18].mxu1  ;;  %3273 = vrcp.f32 %v875_v57 }
 0x589   :  { %v1180_v33 = vpop.f32.mrb[19].mxu1  ;;  %v1212_v36 = vmul.f32 %v3256_v34, %v2837_v50  ;;  %3275 = vrcp.f32 %v876_v60  ;;  %v3685_v47 = vpop.permute.xlu1 %1499 }
 0x58a   :  { %v1211_v35 = vmul.f32 %v3254_v31, %v1180_v33  ;;  %3277 = vrcp.f32 %v877_v63  ;;  %v3694_v33 = vpop.permute.xlu0 %1494  ;;  %v29_v63 = vld [vmem:[%s3894_s2 + $0x78] sm:$0xff] }
 0x58b   :  { %3279 = vrcp.f32 %v878_v2  ;;  %v35_v2 = vld [vmem:[%s3894_s2 + $0xa8] sm:$0xff] }
 0x58c   :  { %2851 = vmatprep.mubr.msk.f32.mxu0 %vm72_vm0, %v1211_v35 }
 0x58d   :  { %2852 = vmatmul.mubr.msk.f32.gmra.mrb[26].mxu0 %vm72_vm0, %v1212_v36  ;;  %v2840_v42 = vpop.f32.mrb[20].mxu1  ;;  %v3687_v28 = vpop.permute.xlu1 %1504 }
 0x58e   :  { %v1190_v45 = vpop.f32.mrb[21].mxu1  ;;  %v1214_v49 = vmul.f32 %v3260_v46, %v2840_v42 }
 0x58f   :  { %v1213_v40 = vmul.f32 %v3258_v43, %v1190_v45 }
 0x591   :  { %2854 = vmatprep.mubr.msk.f32.mxu0 %vm72_vm0, %v1213_v40  ;;  %v3689_v44 = vpop.permute.xlu1 %1509 }
 0x592   :  { %2855 = vmatmul.mubr.msk.f32.gmra.mrb[28].mxu0 %vm72_vm0, %v1214_v49  ;;  %v3274_v14 = vpop.eup %3273 }
 0x593   :  { %v3276_v16 = vpop.eup %3275 }
 0x594   :  { %v2843_v55 = vpop.f32.mrb[22].mxu1  ;;  %v3278_v20 = vpop.eup %3277 }
 0x595   :  { %v1200_v58 = vpop.f32.mrb[23].mxu1  ;;  %v1216_v62 = vmul.f32 %v3264_v59, %v2843_v55  ;;  %v3280_v22 = vpop.eup %3279 }
 0x596   :  { %v1215_v61 = vmul.f32 %v3262_v56, %v1200_v58  ;;  %v3696_v34 = vpop.permute.xlu1 %1514 }
 0x598   :  { %2857 = vmatprep.mubr.msk.f32.mxu0 %vm72_vm0, %v1215_v61  ;;  %v2806_v0 = vpop.f32.mrb[16].mxu0  ;;  %v3721_v61 = vld [vmem:[%s3895_s0 + $0x48] sm:$0xff] }
 0x599   :  { %2858 = vmatmul.mubr.msk.f32.gmra.mrb[30].mxu0 %vm72_vm0, %v1216_v62  ;;  %v1017_v3 = vpop.f32.mrb[17].mxu0  ;;  %v1057_v6 = vmul.f32 %v3268_v4, %v2806_v0  ;;  %v28_v62 = vld [vmem:[%s3894_s2 + $0x70] sm:$0xff] }
 0x59a   :  { %v1056_v5 = vmul.f32 %v3266_v1, %v1017_v3  ;;  %v3704_v48 = vpop.permute.xlu1 %1519  ;;  %v3096_v0 = vpack.c.bf16 %v29_v63, %v28_v62  ;;  %v34_v1 = vld [vmem:[%s3894_s2 + $0xa0] sm:$0xff]  ;;  %v36_v3 = vld [vmem:[%s3894_s2 + $0xb0] sm:$0xff] }
 0x59b   :  { %v3104_v4 = vpack.c.bf16 %v35_v2, %v34_v1 }
 0x59c   :  { %v2809_v7 = vpop.f32.mrb[18].mxu0  ;;  %2864 = vmatprep.mubr.msk.f32.mxu0 %vm72_vm0, %v1056_v5  ;;  %v37_v5 = vld [vmem:[%s3894_s2 + $0xb8] sm:$0xff] }
 0x59d   :  { %v1027_v9 = vpop.f32.mrb[19].mxu0  ;;  %2865 = vmatmul.mubr.msk.f32.vlgmr.msra.gmra.mrb[24].mxu0 %vm72_vm0, %v1057_v6  ;;  %v1059_v12 = vmul.f32 %v3272_v10, %v2809_v7  ;;  %v3108_v6 = vpack.c.bf16 %v37_v5, %v36_v3  ;;  %3105 = vmatprep.subr.bf16.mxu0 %v3104_v4  ;;  %v2472_v7 = vld [vmem:[%s3894_s2 + $0xe2] ss:$0 sm:$0xff] }
 0x59e   :  { %v1058_v11 = vmul.f32 %v3270_v8, %v1027_v9  ;;  %v3712_v58 = vpop.permute.xlu1 %1524  ;;  %3107 = vmatpush3.bf16.msra.mxu0 %v3104_v4 }
 0x59f   :  { %3109 = vmatprep.subr.bf16.mxu0 %v3108_v6 }
 0x5a0   :  { %v2812_v13 = vpop.f32.mrb[20].mxu0  ;;  %2867 = vmatprep.mubr.msk.f32.mxu0 %vm72_vm0, %v1058_v11  ;;  %v32_v11 = vld [vmem:[%s3894_s2 + $0x90] sm:$0xff] }
 0x5a1   :  { %v1037_v15 = vpop.f32.mrb[21].mxu0  ;;  %2868 = vmatmul.mubr.msk.f32.gmra.mrb[26].mxu0 %vm72_vm0, %v1059_v12  ;;  %v1061_v18 = vmul.f32 %v3276_v16, %v2812_v13  ;;  %v33_v12 = vld [vmem:[%s3894_s2 + $0x98] sm:$0xff] }
 0x5a2   :  { %v1060_v17 = vmul.f32 %v3274_v14, %v1037_v15  ;;  %3111 = vmatpush3.bf16.msra.mxu0 %v3108_v6 }
 0x5a4   :  { %v2815_v19 = vpop.f32.mrb[22].mxu0  ;;  %2870 = vmatprep.mubr.msk.f32.mxu0 %vm72_vm0, %v1060_v17  ;;  %v3100_v17 = vpack.c.bf16 %v33_v12, %v32_v11 }
 0x5a5   :  { %v1047_v21 = vpop.f32.mrb[23].mxu0  ;;  %2871 = vmatmul.mubr.msk.f32.gmra.mrb[28].mxu0 %vm72_vm0, %v1061_v18  ;;  %v1063_v24 = vmul.f32 %v3280_v22, %v2815_v19 }
 0x5a6   :  { %v1062_v23 = vmul.f32 %v3278_v20, %v1047_v21 }
 0x5a8   :  { %2873 = vmatprep.mubr.msk.f32.mxu0 %vm72_vm0, %v1062_v23 }
 0x5a9   :  { %2874 = vmatmul.mubr.msk.f32.gmra.mrb[30].mxu0 %vm72_vm0, %v1063_v24  ;;  %v59_v24 = vld [vmem:[%s3895_s0 + $0x58] sm:$0xff] }
 0x670   :  { %v2866_v30 = vpop.f32.mrb[24].mxu0 }
 0x671   :  { %v1480_v50 = vadd.f32 %v2866_v30, %v2471_v29  ;;  %v1436_v31 = vpop.f32.mrb[25].mxu0 }
 0x672   :  { %v1479_v32 = vadd.f32 %v2471_v29, %v1436_v31 }
 0x673   :  { %v1528_v37 = vmul.f32 %v3694_v33, %v1480_v50 }
 0x674   :  { %v1527_v35 = vmul.f32 %v3683_v53, %v1479_v32  ;;  %v2869_v36 = vpop.f32.mrb[26].mxu0 }
 0x675   :  { %v1482_v38 = vadd.f32 %v2869_v36, %v2471_v29  ;;  %v1446_v39 = vpop.f32.mrb[27].mxu0 }
 0x676   :  { %v1481_v41 = vadd.f32 %v2471_v29, %v1446_v39  ;;  %2884 = vmatprep.mubr.msk.f32.mxu1 %vm210_vm1, %v1527_v35  ;;  %v58_v39 = vld [vmem:[%s3895_s0 + $0x50] sm:$0xff] }
 0x677   :  { %2885 = vmatmul.mubr.msk.f32.vlgmr.msra.gmra.mrb[24].mxu1 %vm210_vm1, %v1528_v37  ;;  %v1530_v45 = vmul.f32 %v3687_v28, %v1482_v38  ;;  %v56_v38 = vld [vmem:[%s3895_s0 + $0x40] sm:$0xff] }
 0x678   :  { %v1529_v42 = vmul.f32 %v3685_v47, %v1481_v41  ;;  %v2872_v43 = vpop.f32.mrb[28].mxu0  ;;  %3095 = vmatpush3.bf16.msra.mxu1 %v3092_v27  ;;  %v38_v41 = vld [vmem:[%s3894_s2 + $0xc0] sm:$0xff] }
 0x679   :  { %v1484_v46 = vadd.f32 %v2872_v43, %v2471_v29  ;;  %v1456_v40 = vpop.f32.mrb[29].mxu0  ;;  %3097 = vmatprep.subr.bf16.mxu1 %v3096_v0 }
 0x67a   :  { %v1483_v49 = vadd.f32 %v2471_v29, %v1456_v40  ;;  %2887 = vmatprep.mubr.msk.f32.mxu1 %vm210_vm1, %v1529_v42  ;;  %v39_v42 = vld [vmem:[%s3894_s2 + $0xc8] sm:$0xff] }
 0x67b   :  { %2888 = vmatmul.mubr.msk.f32.gmra.mrb[26].mxu1 %vm210_vm1, %v1530_v45  ;;  %v1532_v54 = vmul.f32 %v3696_v34, %v1484_v46  ;;  %v3112_v43 = vpack.c.bf16 %v39_v42, %v38_v41  ;;  %v2505_v45 = vld [vmem:[%s3894_s2 + $0xe3] ss:$0 sm:$0xff]  ;;  %v2515_v41 = vld [vmem:[%s3894_s2 + $0xe5] ss:$0 sm:$0xff] }
 0x67c   :  { %v1531_v51 = vmul.f32 %v3689_v44, %v1483_v49  ;;  %v2875_v52 = vpop.f32.mrb[30].mxu0 }
 0x67d   :  { %v1486_v55 = vadd.f32 %v2875_v52, %v2471_v29  ;;  %v1466_v56 = vpop.f32.mrb[31].mxu0  ;;  %3113 = vmatprep.subr.bf16.mxu0 %v3112_v43  ;;  %v40_v52 = vld [vmem:[%s3894_s2 + $0xd0] sm:$0xff] }
 0x67e   :  { %v1485_v57 = vadd.f32 %v2471_v29, %v1466_v56  ;;  %2890 = vmatprep.mubr.msk.f32.mxu1 %vm210_vm1, %v1531_v51 }
 0x67f   :  { %2891 = vmatmul.mubr.msk.f32.gmra.mrb[28].mxu1 %vm210_vm1, %v1532_v54  ;;  %v1534_v60 = vmul.f32 %v3712_v58, %v1486_v55  ;;  %v41_v54 = vld [vmem:[%s3894_s2 + $0xd8] sm:$0xff] }
 0x680   :  { %v1533_v59 = vmul.f32 %v3704_v48, %v1485_v57 }
 0x682   :  { %2893 = vmatprep.mubr.msk.f32.mxu1 %vm210_vm1, %v1533_v59 }
 0x683   :  { %2894 = vmatmul.mubr.msk.f32.gmra.mrb[30].mxu1 %vm210_vm1, %v1534_v60 }
 0x684   :  { %2900 = vmatprep.mubr.msk.f32.mxu1 %vm72_vm0, %v3721_v61 }
 0x74a   :  { %v2886_v8 = vpop.f32.mrb[24].mxu1 }
 0x74b   :  { %v1635_v9 = vadd.f32 %v2886_v8, %v2472_v7  ;;  %v1629_v10 = vpop.f32.mrb[25].mxu1 }
 0x74c   :  { %v1630_v13 = vadd.f32 %v2472_v7, %v1629_v10 }
 0x74d   :  { %v1669_v14 = vmax.f32 %v1635_v9, 0.0 }
 0x74e   :  { %v1668_v15 = vmax.f32 %v1630_v13, 0.0  ;;  %v2889_v16 = vpop.f32.mrb[26].mxu1  ;;  %v2506_v13 = vld [vmem:[%s3894_s2 + $0xe4] ss:$0 sm:$0xff] }
 0x74f   :  { %v1645_v18 = vadd.f32 %v2889_v16, %v2472_v7  ;;  %2338 = vst.msk [vmem:[%s3897_s3 + $0x8] sm:$0xff] %vm72_vm0, %v1669_v14  ;;  %v1639_v19 = vpop.f32.mrb[27].mxu1 }
 0x750   :  { %2337 = vst.msk [vmem:[%s3897_s3] sm:$0xff] %vm72_vm0, %v1668_v15  ;;  %v1640_v20 = vadd.f32 %v2472_v7, %v1639_v19  ;;  %2901 = vmatmul.mubr.msk.f32.vlgmr.msra.gmra.mrb[32].mxu1 %vm72_vm0, %v1668_v15 }
 0x751   :  { %v1671_v21 = vmax.f32 %v1645_v18, 0.0  ;;  %2903 = vmatprep.mubr.msk.f32.mxu1 %vm72_vm0, %v1669_v14  ;;  %3099 = vmatpush3.bf16.msra.mxu1 %v3096_v0 }
 0x752   :  { %v1670_v22 = vmax.f32 %v1640_v20, 0.0  ;;  %v2892_v23 = vpop.f32.mrb[28].mxu1  ;;  %3101 = vmatprep.subr.bf16.mxu1 %v3100_v17 }
 0x753   :  { %2340 = vst.msk [vmem:[%s3897_s3 + $0x18] sm:$0xff] %vm72_vm0, %v1671_v21  ;;  %v1655_v25 = vadd.f32 %v2892_v23, %v2472_v7  ;;  %v1649_v26 = vpop.f32.mrb[29].mxu1 }
 0x754   :  { %2339 = vst.msk [vmem:[%s3897_s3 + $0x10] sm:$0xff] %vm72_vm0, %v1670_v22  ;;  %v1650_v27 = vadd.f32 %v2472_v7, %v1649_v26  ;;  %2904 = vmatmul.mubr.msk.f32.gmra.mrb[34].mxu1 %vm72_vm0, %v1670_v22 }
 0x755   :  { %v1673_v29 = vmax.f32 %v1655_v25, 0.0  ;;  %2906 = vmatprep.mubr.msk.f32.mxu1 %vm72_vm0, %v59_v24 }
 0x756   :  { %v1672_v30 = vmax.f32 %v1650_v27, 0.0  ;;  %v2895_v50 = vpop.f32.mrb[30].mxu1 }
 0x757   :  { %2342 = vst.msk [vmem:[%s3897_s3 + $0x28] sm:$0xff] %vm72_vm0, %v1673_v29  ;;  %v1665_v31 = vadd.f32 %v2895_v50, %v2472_v7  ;;  %v1659_v32 = vpop.f32.mrb[31].mxu1 }
 0x758   :  { %2341 = vst.msk [vmem:[%s3897_s3 + $0x20] sm:$0xff] %vm72_vm0, %v1672_v30  ;;  %v1660_v35 = vadd.f32 %v2472_v7, %v1659_v32  ;;  %2907 = vmatmul.mubr.msk.f32.gmra.mrb[36].mxu1 %vm72_vm0, %v1672_v30 }
 0x759   :  { %v1675_v36 = vmax.f32 %v1665_v31, 0.0  ;;  %2909 = vmatprep.mubr.msk.f32.mxu1 %vm72_vm0, %v1673_v29 }
 0x75a   :  { %v1674_v37 = vmax.f32 %v1660_v35, 0.0 }
 0x75b   :  { %2344 = vst.msk [vmem:[%s3897_s3 + $0x38] sm:$0xff] %vm72_vm0, %v1675_v36 }
 0x75c   :  { %2343 = vst.msk [vmem:[%s3897_s3 + $0x30] sm:$0xff] %vm72_vm0, %v1674_v37  ;;  %2910 = vmatmul.mubr.msk.f32.gmra.mrb[38].mxu1 %vm72_vm0, %v1674_v37 }
 0x75d   :  { %2916 = vmatprep.mubr.msk.f32.mxu1 %vm72_vm0, %v56_v38 }
 0x760   :  { %2917 = vmatmul.mubr.msk.f32.vlgmr.msra.gmra.mrb[32].mxu1 %vm72_vm0, %v3721_v61  ;;  %v3116_v61 = vpack.c.bf16 %v41_v54, %v40_v52 }
 0x761   :  { %2919 = vmatprep.mubr.msk.f32.mxu1 %vm72_vm0, %v1668_v15  ;;  %3103 = vmatpush3.bf16.msra.mxu1 %v3100_v17 }
 0x764   :  { %2920 = vmatmul.mubr.msk.f32.gmra.mrb[34].mxu1 %vm72_vm0, %v1669_v14 }
 0x765   :  { %2922 = vmatprep.mubr.msk.f32.mxu1 %vm72_vm0, %v58_v39 }
 0x768   :  { %2923 = vmatmul.mubr.msk.f32.gmra.mrb[36].mxu1 %vm72_vm0, %v59_v24 }
 0x769   :  { %2925 = vmatprep.mubr.msk.f32.mxu1 %vm72_vm0, %v1672_v30 }
 0x76c   :  { %2926 = vmatmul.mubr.msk.f32.gmra.mrb[38].mxu1 %vm72_vm0, %v1673_v29 }
 0x76d   :  { %2932 = vmatprep.mubr.msk.f32.mxu1 %vm72_vm0, %v1668_v15 }
 0x770   :  { %2933 = vmatmul.mubr.msk.f32.vlgmr.msra.gmra.mrb[32].mxu1 %vm72_vm0, %v1669_v14 }
 0x771   :  { %2935 = vmatprep.mubr.msk.f32.mxu1 %vm72_vm0, %v1670_v22 }
 0x774   :  { %2936 = vmatmul.mubr.msk.f32.gmra.mrb[34].mxu1 %vm72_vm0, %v1671_v21 }
 0x775   :  { %2938 = vmatprep.mubr.msk.f32.mxu1 %vm72_vm0, %v1672_v30 }
 0x778   :  { %2939 = vmatmul.mubr.msk.f32.gmra.mrb[36].mxu1 %vm72_vm0, %v1673_v29 }
 0x779   :  { %2941 = vmatprep.mubr.msk.f32.mxu1 %vm72_vm0, %v1674_v37 }
 0x77c   :  { %2942 = vmatmul.mubr.msk.f32.gmra.mrb[38].mxu1 %vm72_vm0, %v1675_v36  ;;  %vm2377_vm0 = vcmask 195712  }
 0x843   :  { %v2934_v46 = vpop.f32.mrb[32].mxu1 }
 0x844   :  { %v2040_v40 = vadd.f32 %v2934_v46, %v2505_v45  ;;  %v1988_v49 = vpop.f32.mrb[33].mxu1 }
 0x845   :  { %v2039_v51 = vadd.f32 %v2505_v45, %v1988_v49 }
 0x846   :  { %v2048_v57 = vmax.f32 %v2040_v40, 0.0 }
 0x847   :  { %v2047_v55 = vmax.f32 %v2039_v51, 0.0  ;;  %v2937_v56 = vpop.f32.mrb[34].mxu1 }
 0x848   :  { %v2042_v59 = vadd.f32 %v2937_v56, %v2505_v45  ;;  %v1998_v60 = vpop.f32.mrb[35].mxu1 }
 0x849   :  { %v2041_v62 = vadd.f32 %v2505_v45, %v1998_v60  ;;  %2952 = vmatprep.mubr.msk.f32.mxu0 %vm210_vm1, %v2047_v55 }
 0x84a   :  { %2953 = vmatmul.mubr.msk.f32.vlgmr.msra.gmra.mrb[32].mxu0 %vm210_vm1, %v2048_v57  ;;  %v2050_v1 = vmax.f32 %v2042_v59, 0.0 }
 0x84b   :  { %v2049_v63 = vmax.f32 %v2041_v62, 0.0  ;;  %v2940_v0 = vpop.f32.mrb[36].mxu1  ;;  %3115 = vmatpush3.bf16.msra.mxu0 %v3112_v43 }
 0x84c   :  { %v2044_v2 = vadd.f32 %v2940_v0, %v2505_v45  ;;  %v2008_v3 = vpop.f32.mrb[37].mxu1  ;;  %3117 = vmatprep.subr.bf16.mxu0 %v3116_v61 }
 0x84d   :  { %v2043_v4 = vadd.f32 %v2505_v45, %v2008_v3  ;;  %2955 = vmatprep.mubr.msk.f32.mxu0 %vm210_vm1, %v2049_v63 }
 0x84e   :  { %2956 = vmatmul.mubr.msk.f32.gmra.mrb[34].mxu0 %vm210_vm1, %v2050_v1  ;;  %v2052_v7 = vmax.f32 %v2044_v2, 0.0 }
 0x84f   :  { %v2051_v5 = vmax.f32 %v2043_v4, 0.0  ;;  %v2943_v6 = vpop.f32.mrb[38].mxu1  ;;  %3119 = vmatpush3.bf16.msra.mxu0 %v3116_v61 }
 0x850   :  { %v2046_v8 = vadd.f32 %v2943_v6, %v2505_v45  ;;  %v2018_v9 = vpop.f32.mrb[39].mxu1 }
 0x851   :  { %v2045_v10 = vadd.f32 %v2505_v45, %v2018_v9  ;;  %2958 = vmatprep.mubr.msk.f32.mxu0 %vm210_vm1, %v2051_v5 }
 0x852   :  { %2959 = vmatmul.mubr.msk.f32.gmra.mrb[36].mxu0 %vm210_vm1, %v2052_v7  ;;  %v2054_v12 = vmax.f32 %v2046_v8, 0.0 }
 0x853   :  { %v2053_v11 = vmax.f32 %v2045_v10, 0.0 }
 0x855   :  { %2961 = vmatprep.mubr.msk.f32.mxu0 %vm210_vm1, %v2053_v11 }
 0x856   :  { %2962 = vmatmul.mubr.msk.f32.gmra.mrb[38].mxu0 %vm210_vm1, %v2054_v12 }
 0x91d   :  { %v2954_v14 = vpop.f32.mrb[32].mxu0 }
 0x91e   :  { %v2155_v15 = vadd.f32 %v2954_v14, %v2506_v13  ;;  %v2149_v16 = vpop.f32.mrb[33].mxu0 }
 0x91f   :  { %v2150_v17 = vadd.f32 %v2506_v13, %v2149_v16 }
 0x920   :  { %v2189_v20 = vmax.f32 %v2155_v15, 0.0 }
 0x921   :  { %v2188_v18 = vmax.f32 %v2150_v17, 0.0  ;;  %v2957_v19 = vpop.f32.mrb[34].mxu0 }
 0x922   :  { %v2165_v21 = vadd.f32 %v2957_v19, %v2506_v13  ;;  %v2159_v22 = vpop.f32.mrb[35].mxu0 }
 0x923   :  { %v2160_v23 = vadd.f32 %v2506_v13, %v2159_v22  ;;  %2972 = vmatprep.mubr.msk.f32.mxu0 %vm210_vm1, %v2188_v18 }
 0x924   :  { %2973 = vmatmul.mubr.msk.f32.vlgmr.msra.gmra.mrb[40].mxu0 %vm210_vm1, %v2189_v20  ;;  %v2191_v26 = vmax.f32 %v2165_v21, 0.0 }
 0x925   :  { %v2190_v24 = vmax.f32 %v2160_v23, 0.0  ;;  %v2960_v25 = vpop.f32.mrb[36].mxu0 }
 0x926   :  { %v2175_v27 = vadd.f32 %v2960_v25, %v2506_v13  ;;  %v2169_v29 = vpop.f32.mrb[37].mxu0 }
 0x927   :  { %v2170_v30 = vadd.f32 %v2506_v13, %v2169_v29  ;;  %2975 = vmatprep.mubr.msk.f32.mxu0 %vm210_vm1, %v2190_v24 }
 0x928   :  { %2976 = vmatmul.mubr.msk.f32.gmra.mrb[42].mxu0 %vm210_vm1, %v2191_v26  ;;  %v2193_v32 = vmax.f32 %v2175_v27, 0.0 }
 0x929   :  { %v2192_v50 = vmax.f32 %v2170_v30, 0.0  ;;  %v2963_v31 = vpop.f32.mrb[38].mxu0 }
 0x92a   :  { %v2185_v35 = vadd.f32 %v2963_v31, %v2506_v13  ;;  %v2179_v36 = vpop.f32.mrb[39].mxu0 }
 0x92b   :  { %v2180_v37 = vadd.f32 %v2506_v13, %v2179_v36  ;;  %2978 = vmatprep.mubr.msk.f32.mxu0 %vm210_vm1, %v2192_v50 }
 0x92c   :  { %2979 = vmatmul.mubr.msk.f32.gmra.mrb[44].mxu0 %vm210_vm1, %v2193_v32  ;;  %v2195_v39 = vmax.f32 %v2185_v35, 0.0 }
 0x92d   :  { %v2194_v38 = vmax.f32 %v2180_v37, 0.0 }
 0x92f   :  { %2981 = vmatprep.mubr.msk.f32.mxu0 %vm210_vm1, %v2194_v38 }
 0x930   :  { %2982 = vmatmul.mubr.msk.f32.gmra.mrb[46].mxu0 %vm210_vm1, %v2195_v39 }
 0x9f7   :  { %v2974_v42 = vpop.f32.mrb[40].mxu0 }
 0x9f8   :  { %v2296_v43 = vadd.f32 %v2974_v42, %v2515_v41  ;;  %v2290_v45 = vpop.f32.mrb[41].mxu0 }
 0x9f9   :  { %v2291_v40 = vadd.f32 %v2515_v41, %v2290_v45 }
 0x9fa   :  { %v2330_v46 = vmul.f32 %v2296_v43, %v3694_v33 }
 0x9fb   :  { %v2977_v49 = vpop.f32.mrb[42].mxu0  ;;  %v2329_v54 = vmul.f32 %v2291_v40, %v3683_v53 }
 0x9fc   :  { %2355 = vrot.lane.b32.xlu1 %v2330_v46, %s3287_s17  ;;  %v2300_v51 = vpop.f32.mrb[43].mxu0  ;;  %v2306_v55 = vadd.f32 %v2977_v49, %v2515_v41 }
 0x9fd   :  { %v2301_v52 = vadd.f32 %v2515_v41, %v2300_v51 }
 0x9fe   :  { %v2332_v61 = vmul.f32 %v2306_v55, %v3687_v28 }
 0x9ff   :  { %v2331_v56 = vmul.f32 %v2301_v52, %v3685_v47  ;;  %v2980_v57 = vpop.f32.mrb[44].mxu0 }
 0xa00   :  { %v2310_v59 = vpop.f32.mrb[45].mxu0  ;;  %2353 = vrot.lane.b32.xlu1 %v2329_v54, %s3287_s17  ;;  %v2316_v62 = vadd.f32 %v2980_v57, %v2515_v41 }
 0xa01   :  { %v2311_v60 = vadd.f32 %v2515_v41, %v2310_v59  ;;  %2357 = vrot.lane.b32.xlu0 %v2331_v56, %s3287_s17 }
 0xa02   :  { %v2334_v53 = vmul.f32 %v2316_v62, %v3696_v34 }
 0xa03   :  { %v2333_v33 = vmul.f32 %v2311_v60, %v3689_v44  ;;  %v2983_v63 = vpop.f32.mrb[46].mxu0 }
 0xa04   :  { %2359 = vrot.lane.b32.xlu1 %v2332_v61, %s3287_s17  ;;  %v2320_v0 = vpop.f32.mrb[47].mxu0  ;;  %v2326_v2 = vadd.f32 %v2983_v63, %v2515_v41 }
 0xa05   :  { %v2321_v1 = vadd.f32 %v2515_v41, %v2320_v0  ;;  %2361 = vrot.lane.b32.xlu0 %v2333_v33, %s3287_s17 }
 0xa06   :  { %v2336_v3 = vmul.f32 %v2326_v2, %v3712_v58 }
 0xa07   :  { %v2335_v47 = vmul.f32 %v2321_v1, %v3704_v48 }
 0xa08   :  { %2363 = vrot.lane.b32.xlu1 %v2334_v53, %s3287_s17 }
 0xa09   :  { %2365 = vrot.lane.b32.xlu0 %v2335_v47, %s3287_s17 }
 0xa0c   :  { %2367 = vrot.lane.b32.xlu1 %v2336_v3, %s3287_s17 }
 0xa6e   :  { %v2356_v28 = vpop.permute.xlu1 %2355 }
 0xa6f   :  { %2379 = vst.msk [vmem:[%s3897_s3 + $0x8] sm:$0xff] %vm2377_vm0, %v2356_v28 }
 0xa72   :  { %v2354_v44 = vpop.permute.xlu1 %2353 }
 0xa73   :  { %2378 = vst.msk [vmem:[%s3897_s3] sm:$0xff] %vm2377_vm0, %v2354_v44  ;;  %v2358_v34 = vpop.permute.xlu0 %2357 }
 0xa74   :  { %2380 = vst.msk [vmem:[%s3897_s3 + $0x10] sm:$0xff] %vm2377_vm0, %v2358_v34 }
 0xa76   :  { %v2360_v48 = vpop.permute.xlu1 %2359 }
 0xa77   :  { %2381 = vst.msk [vmem:[%s3897_s3 + $0x18] sm:$0xff] %vm2377_vm0, %v2360_v48  ;;  %v2362_v58 = vpop.permute.xlu0 %2361 }
 0xa78   :  { %2382 = vst.msk [vmem:[%s3897_s3 + $0x20] sm:$0xff] %vm2377_vm0, %v2362_v58 }
 0xa7a   :  { %v2364_v4 = vpop.permute.xlu1 %2363 }
 0xa7b   :  { %2383 = vst.msk [vmem:[%s3897_s3 + $0x28] sm:$0xff] %vm2377_vm0, %v2364_v4  ;;  %v2366_v5 = vpop.permute.xlu0 %2365 }
 0xa7c   :  { %2384 = vst.msk [vmem:[%s3897_s3 + $0x30] sm:$0xff] %vm2377_vm0, %v2366_v5 }
 0xa7e   :  { %v2368_v6 = vpop.permute.xlu1 %2367 }
 0xa7f   :  { %2385 = vst.msk [vmem:[%s3897_s3 + $0x38] sm:$0xff] %vm2377_vm0, %v2368_v6 }

</bundles_post_ra>
